<compile_context>
chip_gen: v7x
topology: tpu7x:2x2x1
jax: 0.10.0
libtpu: 0.0.40
codegen_flags: <defaults>
</compile_context>

<pallas_src>
import functools

import jax
import jax.numpy as jnp
from jax import lax
from jax.experimental import pallas as pl
from jax.experimental.pallas import tpu as pltpu


def _bitonic_topk_sum(hard_neg, topk):
    """Exact top-`topk` sum per row via a full lane bitonic sort (ascending).

    Requires C to be a power of two and a multiple of 128 so every
    compare-exchange is a plain static lane rotation (pltpu.roll).  At C=128
    this is 28 stages x 2 rolls, versus ~4 cross-lane ops x topk steps for
    iterative max extraction.  Exact under ties because only the sum matters.
    """
    TB, C = hard_neg.shape
    lane = lax.broadcasted_iota(jnp.int32, (TB, C), 1)
    x = hard_neg
    k = 2
    while k <= C:
        j = k // 2
        while j >= 1:
            is_lower = (lane & j) == 0
            # partner value a[i ^ j]: a[i + j] on lower lanes, a[i - j] on upper.
            partner = jnp.where(is_lower,
                                pltpu.roll(x, C - j, 1),
                                pltpu.roll(x, j, 1))
            if k >= C:
                # final merge: (lane & C) == 0 for every lane < C.
                take_min = is_lower
            else:
                take_min = ((lane & k) == 0) == is_lower
            x = jnp.where(take_min,
                          jnp.minimum(x, partner),
                          jnp.maximum(x, partner))
            j //= 2
        k *= 2
    # ascending sort -> the top-k values occupy the last `topk` lanes.
    return jnp.sum(jnp.where(lane >= C - topk, x, 0.0))


def _iterative_topk_sum(hard_neg, topk):
    """Fallback for non power-of-two C: multiplicity-counting max extraction.

    Per step: one lane max-reduce, one lane sum-reduce of the tie mask, one
    knockout select.  No argmin-of-first-index / index broadcast.  Ties are
    handled exactly by taking min(k_remaining, multiplicity) copies of each
    distinct value, which matches torch.topk's sum bit-for-bit.
    """
    TB, C = hard_neg.shape
    neg_inf = jnp.float32(-jnp.inf)

    def body(_, carry):
        work, acc, k_rem = carry
        row_max = jnp.max(work, axis=1, keepdims=True)                 # [TB,1]
        is_max = work == row_max                                       # [TB,C]
        n_max = jnp.sum(is_max.astype(jnp.float32), axis=1, keepdims=True)
        take = jnp.clip(k_rem, 0.0, n_max)                             # [TB,1]
        # take > 0 implies row_max is finite; guard avoids -inf * 0 = NaN.
        acc = acc + jnp.where(take > 0.0, row_max, 0.0) * take
        k_rem = k_rem - n_max
        work = jnp.where(is_max, neg_inf, work)
        return work, acc, k_rem

    init = (hard_neg,
            jnp.zeros((TB, 1), jnp.float32),
            jnp.full((TB, 1), jnp.float32(topk)))
    _, acc, _ = lax.fori_loop(0, topk, body, init, unroll=True)
    return jnp.sum(acc)


def hs_lr_kernel(logits_ref, tgt_ref, out_ref, *, topk, batch, use_bitonic):
    """One (TB, C) tile of the batch; writes 3 partial sums to its own block."""
    eps = 1e-07
    pid = pl.program_id(0)

    # Stream native dtype from HBM, compute in f32 (v5e has no bf16 VPU/EUP).
    x = logits_ref[...].astype(jnp.float32)        # [TB, C]
    tgt = tgt_ref[...]                             # [TB, 1] int32
    TB, C = x.shape

    # Row validity (masks padded rows of a partial last tile).
    row_ids = pid * TB + lax.broadcasted_iota(jnp.int32, (TB, 1), 0)
    row_valid = row_ids < batch                    # [TB, 1] bool

    class_ids = lax.broadcasted_iota(jnp.int32, (TB, C), 1)
    pos_mask = (class_ids == tgt) & row_valid      # [TB, C] bool one-hot

    probs = jax.nn.sigmoid(x)

    # Positive term: gather the target probability per row, log on the [TB,1]
    # vector only (skips a full-tile log pass).  Exactly equals
    # sum(onehot * log(probs + eps)) of the reference.
    tgt_ok = row_valid & (tgt >= 0) & (tgt < C)    # [TB, 1] bool
    p_t = jnp.sum(jnp.where(pos_mask, probs, 0.0), axis=1, keepdims=True)
    pos_partial = jnp.sum(jnp.where(tgt_ok, jnp.log(p_t + eps), 0.0))
    count_partial = jnp.sum(tgt_ok.astype(jnp.float32))

    # hard_neg_loss = -(1 - onehot) * log(1 - p + eps); one fused select zeroes
    # both the positive class (matching the reference, where it is exactly 0
    # and still participates in the top-k) and padded rows (which then
    # contribute 0 to the top-k sum).
    pred_n = jnp.log(1.0 - probs + eps)
    dead = pos_mask | jnp.logical_not(row_valid)
    hard_neg = jnp.where(dead, 0.0, -pred_n)       # [TB, C]

    if use_bitonic:
        topk_partial = _bitonic_topk_sum(hard_neg, topk)
    else:
        topk_partial = _iterative_topk_sum(hard_neg, topk)

    # Emit the three per-tile partials into lanes 0..2 of sublane 0 of this
    # tile's (1, 8, 128) output block (lane-dense, unmasked store).
    sub = lax.broadcasted_iota(jnp.int32, (1, 8, 128), 1)
    lan = lax.broadcasted_iota(jnp.int32, (1, 8, 128), 2)
    row0 = sub == 0
    blk = jnp.where(row0 & (lan == 0), pos_partial,
          jnp.where(row0 & (lan == 1), count_partial,
          jnp.where(row0 & (lan == 2), topk_partial, jnp.float32(0.0))))
    out_ref[...] = blk


def hs_lr_loss(logits, targets, *, num_classes, alpha, topratio, block_b=512):
    """Pallas implementation of HS_LR.forward(inputs, targets) -> scalar."""
    topk = int(num_classes * topratio)
    B, C = logits.shape
    assert C == num_classes and 0 < topk <= C

    # Batch tile: full B if it fits, otherwise a multiple-of-8 tile (last tile
    # may be partial; padded rows are masked inside the kernel).  Kernel is
    # compute-bound, so the tile only needs to amortize per-step overhead.
    if B <= block_b:
        tb = B
    else:
        tb = (block_b // 8) * 8
    num_tiles = pl.cdiv(B, tb)

    # Bitonic lane sort needs a power-of-two class dim that is a whole number
    # of lane vregs; otherwise fall back to the iterative extractor.
    use_bitonic = (C % 128 == 0) and ((C & (C - 1)) == 0)

    kern = functools.partial(
        hs_lr_kernel, topk=topk, batch=B, use_bitonic=use_bitonic)

    partials = pl.pallas_call(
        kern,
        out_shape=jax.ShapeDtypeStruct((num_tiles, 8, 128), jnp.float32),
        grid_spec=pltpu.PrefetchScalarGridSpec(
            num_scalar_prefetch=0,
            grid=(num_tiles,),
            in_specs=[
                pl.BlockSpec((tb, C), lambda i: (i, 0)),
                pl.BlockSpec((tb, 1), lambda i: (i, 0)),
            ],
            out_specs=pl.BlockSpec((1, 8, 128), lambda i: (i, 0, 0)),
        ),
        compiler_params=pltpu.CompilerParams(
            dimension_semantics=("parallel",)),
    )(logits, targets.astype(jnp.int32).reshape(B, 1))

    # Tiny epilogue in plain JAX: combine per-tile partials + loss formula.
    pos_sum = jnp.sum(partials[:, 0, 0])
    count_pos = jnp.sum(partials[:, 0, 1])   # NaN if no valid targets (matches ref)
    topk_sum = jnp.sum(partials[:, 0, 2])
    topk_neg_mean = -topk_sum / jnp.float32(B * topk)
    loss = pos_sum / count_pos + jnp.float32(alpha) * topk_neg_mean
    return -1.0 * loss


def hs_lr_ref(logits, targets, *, num_classes, alpha, topratio):
    """Pure-JAX reference mirroring the PyTorch forward."""
    eps = 1e-07
    logits = logits.astype(jnp.float32)
    probs = jax.nn.sigmoid(logits)
    onehot = jax.nn.one_hot(targets, num_classes, dtype=jnp.float32)
    pred_p = jnp.log(probs + eps)
    pred_n = jnp.log(1.0 - probs + eps)
    topk = int(num_classes * topratio)
    count_pos = onehot.sum()
    hard_neg = -1.0 * (1.0 - onehot) * pred_n
    topk_neg = -1.0 * lax.top_k(hard_neg, topk)[0]
    loss = (onehot * pred_p).sum() / count_pos + alpha * topk_neg.mean()
    return -1.0 * loss


if __name__ == "__main__":
    ALPHA, TOPRATIO = 0.5, 0.1

    key = jax.random.PRNGKey(0)

    def check(logits, targets, num_classes, block_b):
        out = jax.block_until_ready(
            hs_lr_loss(logits, targets, num_classes=num_classes,
                       alpha=ALPHA, topratio=TOPRATIO, block_b=block_b))
        ref = hs_lr_ref(logits, targets, num_classes=num_classes,
                        alpha=ALPHA, topratio=TOPRATIO)
        assert jnp.allclose(out, ref, rtol=1e-5, atol=1e-5), (out, ref)

    # Case 1: single-tile path, C=128 (bitonic sort, topk=12), grid = 1.
    k1, k2, key = jax.random.split(key, 3)
    logits1 = jax.random.normal(k1, (8, 128), dtype=jnp.float32)
    targets1 = jax.random.randint(k2, (8,), 0, 128, dtype=jnp.int32)
    check(logits1, targets1, 128, 512)

    # Case 2: multi-tile grid with a partial last tile (B=20, TB=8 -> 3 tiles).
    k3, k4, key = jax.random.split(key, 3)
    logits2 = jax.random.normal(k3, (20, 128), dtype=jnp.float32)
    targets2 = jax.random.randint(k4, (20,), 0, 128, dtype=jnp.int32)
    check(logits2, targets2, 128, 8)

    # Case 3: bf16 logits streamed natively, multi-tile (B=32, TB=16 -> 2 tiles).
    k5, k6, key = jax.random.split(key, 3)
    logits3 = jax.random.normal(k5, (32, 128), dtype=jnp.bfloat16)
    targets3 = jax.random.randint(k6, (32,), 0, 128, dtype=jnp.int32)
    check(logits3, targets3, 128, 16)

    # Case 4: non power-of-two class dim (C=96, topk=9) -> iterative fallback.
    k7, k8 = jax.random.split(key)
    logits4 = jax.random.normal(k7, (16, 96), dtype=jnp.float32)
    targets4 = jax.random.randint(k8, (16,), 0, 96, dtype=jnp.int32)
    check(logits4, targets4, 96, 512)

    print("KERNEL_OK")
</pallas_src>

<mosaic_0001>
module attributes {stable_mosaic.version = 11 : i64} {
  func.func @hs_lr_kernel(%arg0: i32, %arg1: memref<8x128xf32, #tpu.memory_space<vmem>>, %arg2: memref<8x1xi32, #tpu.memory_space<vmem>>, %arg3: memref<1x8x128xf32, #tpu.memory_space<vmem>>) attributes {dimension_semantics = [#tpu.dimension_semantics<parallel>], iteration_bounds = array<i64: 1>, scalar_prefetch = 0 : i64, scratch_operands = 0 : i64, tpu.core_type = #tpu.core_type<tc>, window_params = [{transform_indices = @transform_0, window_bounds = array<i64: 8, 128>}, {transform_indices = @transform_1, window_bounds = array<i64: 8, 1>}, {transform_indices = @transform_2, window_bounds = array<i64: 1, 8, 128>}]} {
    %c0 = arith.constant 0 : index
    %c0_0 = arith.constant 0 : index
    %0 = vector.load %arg1[%c0, %c0_0] : memref<8x128xf32, #tpu.memory_space<vmem>>, vector<8x128xf32>
    %c0_1 = arith.constant 0 : index
    %c0_2 = arith.constant 0 : index
    %1 = vector.load %arg2[%c0_1, %c0_2] : memref<8x1xi32, #tpu.memory_space<vmem>>, vector<8x1xi32>
    %c8_i32 = arith.constant 8 : i32
    %2 = arith.muli %arg0, %c8_i32 : i32
    %3 = tpu.iota {dimensions = array<i32: 0>} : vector<8x1xi32>
    %4 = vector.broadcast %2 : i32 to vector<8x1xi32>
    %5 = arith.addi %4, %3 : vector<8x1xi32>
    %c8_i32_3 = arith.constant 8 : i32
    %6 = vector.broadcast %c8_i32_3 : i32 to vector<8x1xi32>
    %7 = arith.cmpi slt, %5, %6 : vector<8x1xi32>
    %8 = tpu.iota {dimensions = array<i32: 1>} : vector<8x128xi32>
    %9 = vector.broadcast %1 : vector<8x1xi32> to vector<8x128xi32>
    %10 = arith.cmpi eq, %8, %9 : vector<8x128xi32>
    %11 = vector.broadcast %7 : vector<8x1xi1> to vector<8x128xi1>
    %12 = arith.andi %10, %11 : vector<8x128xi1>
    %13 = arith.negf %0 : vector<8x128xf32>
    %14 = math.exp %13 : vector<8x128xf32>
    %cst = arith.constant 1.000000e+00 : f32
    %15 = vector.broadcast %cst : f32 to vector<8x128xf32>
    %16 = arith.addf %15, %14 : vector<8x128xf32>
    %17 = arith.divf %15, %16 : vector<8x128xf32>
    %c0_i32 = arith.constant 0 : i32
    %18 = vector.broadcast %c0_i32 : i32 to vector<8x1xi32>
    %19 = arith.cmpi sge, %1, %18 : vector<8x1xi32>
    %20 = arith.andi %7, %19 : vector<8x1xi1>
    %c128_i32 = arith.constant 128 : i32
    %21 = vector.broadcast %c128_i32 : i32 to vector<8x1xi32>
    %22 = arith.cmpi slt, %1, %21 : vector<8x1xi32>
    %23 = arith.andi %20, %22 : vector<8x1xi1>
    %cst_4 = arith.constant 0.000000e+00 : f32
    %24 = vector.broadcast %cst_4 : f32 to vector<8x128xf32>
    %25 = arith.select %12, %17, %24 : vector<8x128xi1>, vector<8x128xf32>
    %cst_5 = arith.constant dense<0.000000e+00> : vector<8xf32>
    %26 = vector.multi_reduction <add>, %25, %cst_5 [1] : vector<8x128xf32> to vector<8xf32>
    %27 = vector.shape_cast %26 : vector<8xf32> to vector<8x1xf32>
    %cst_6 = arith.constant 1.000000e-07 : f32
    %28 = vector.broadcast %cst_6 : f32 to vector<8x1xf32>
    %29 = arith.addf %27, %28 : vector<8x1xf32>
    %30 = math.log %29 : vector<8x1xf32>
    %cst_7 = arith.constant 0.000000e+00 : f32
    %31 = vector.broadcast %cst_7 : f32 to vector<8x1xf32>
    %32 = arith.select %23, %30, %31 : vector<8x1xi1>, vector<8x1xf32>
    %33 = vector.shape_cast %32 : vector<8x1xf32> to vector<1x8x1xf32>
    %cst_8 = arith.constant dense<0.000000e+00> : vector<1xf32>
    %34 = vector.multi_reduction <add>, %33, %cst_8 [1, 2] : vector<1x8x1xf32> to vector<1xf32>
    %35 = vector.shape_cast %34 : vector<1xf32> to vector<1x1x1xf32>
    %36 = vector.extract %35[0, 0, 0] : f32 from vector<1x1x1xf32>
    %37 = arith.extui %23 : vector<8x1xi1> to vector<8x1xi32>
    %38 = arith.sitofp %37 : vector<8x1xi32> to vector<8x1xf32>
    %39 = vector.shape_cast %38 : vector<8x1xf32> to vector<1x8x1xf32>
    %cst_9 = arith.constant dense<0.000000e+00> : vector<1xf32>
    %40 = vector.multi_reduction <add>, %39, %cst_9 [1, 2] : vector<1x8x1xf32> to vector<1xf32>
    %41 = vector.shape_cast %40 : vector<1xf32> to vector<1x1x1xf32>
    %42 = vector.extract %41[0, 0, 0] : f32 from vector<1x1x1xf32>
    %cst_10 = arith.constant 1.000000e+00 : f32
    %43 = vector.broadcast %cst_10 : f32 to vector<8x128xf32>
    %44 = arith.subf %43, %17 : vector<8x128xf32>
    %cst_11 = arith.constant 1.000000e-07 : f32
    %45 = vector.broadcast %cst_11 : f32 to vector<8x128xf32>
    %46 = arith.addf %44, %45 : vector<8x128xf32>
    %47 = math.log %46 : vector<8x128xf32>
    %cst_12 = arith.constant dense<true> : vector<8x1xi1>
    %48 = arith.xori %7, %cst_12 : vector<8x1xi1>
    %49 = vector.broadcast %48 : vector<8x1xi1> to vector<8x128xi1>
    %50 = arith.ori %12, %49 : vector<8x128xi1>
    %cst_13 = arith.constant 0.000000e+00 : f32
    %51 = vector.broadcast %cst_13 : f32 to vector<8x128xf32>
    %52 = arith.subf %51, %47 : vector<8x128xf32>
    %cst_14 = arith.constant 0.000000e+00 : f32
    %53 = vector.broadcast %cst_14 : f32 to vector<8x128xf32>
    %54 = arith.select %50, %53, %52 : vector<8x128xi1>, vector<8x128xf32>
    %55 = tpu.iota {dimensions = array<i32: 1>} : vector<8x128xi32>
    %c1_i32 = arith.constant 1 : i32
    %56 = vector.broadcast %c1_i32 : i32 to vector<8x128xi32>
    %57 = arith.andi %55, %56 : vector<8x128xi32>
    %c0_i32_15 = arith.constant 0 : i32
    %58 = vector.broadcast %c0_i32_15 : i32 to vector<8x128xi32>
    %59 = arith.cmpi eq, %57, %58 : vector<8x128xi32>
    %c127_i32 = arith.constant 127 : i32
    %60 = tpu.dynamic_rotate %54 by %c127_i32 dim 1 : vector<8x128xf32>, i32 -> vector<8x128xf32>
    %c1_i32_16 = arith.constant 1 : i32
    %61 = tpu.dynamic_rotate %54 by %c1_i32_16 dim 1 : vector<8x128xf32>, i32 -> vector<8x128xf32>
    %62 = arith.select %59, %60, %61 : vector<8x128xi1>, vector<8x128xf32>
    %c2_i32 = arith.constant 2 : i32
    %63 = vector.broadcast %c2_i32 : i32 to vector<8x128xi32>
    %64 = arith.andi %55, %63 : vector<8x128xi32>
    %c0_i32_17 = arith.constant 0 : i32
    %65 = vector.broadcast %c0_i32_17 : i32 to vector<8x128xi32>
    %66 = arith.cmpi eq, %64, %65 : vector<8x128xi32>
    %67 = arith.xori %66, %59 : vector<8x128xi1>
    %cst_18 = arith.constant dense<true> : vector<8x128xi1>
    %68 = arith.xori %67, %cst_18 : vector<8x128xi1>
    %69 = arith.minimumf %54, %62 : vector<8x128xf32>
    %70 = arith.maximumf %54, %62 : vector<8x128xf32>
    %71 = arith.select %68, %69, %70 : vector<8x128xi1>, vector<8x128xf32>
    %c2_i32_19 = arith.constant 2 : i32
    %72 = vector.broadcast %c2_i32_19 : i32 to vector<8x128xi32>
    %73 = arith.andi %55, %72 : vector<8x128xi32>
    %c0_i32_20 = arith.constant 0 : i32
    %74 = vector.broadcast %c0_i32_20 : i32 to vector<8x128xi32>
    %75 = arith.cmpi eq, %73, %74 : vector<8x128xi32>
    %c126_i32 = arith.constant 126 : i32
    %76 = tpu.dynamic_rotate %71 by %c126_i32 dim 1 : vector<8x128xf32>, i32 -> vector<8x128xf32>
    %c2_i32_21 = arith.constant 2 : i32
    %77 = tpu.dynamic_rotate %71 by %c2_i32_21 dim 1 : vector<8x128xf32>, i32 -> vector<8x128xf32>
    %78 = arith.select %75, %76, %77 : vector<8x128xi1>, vector<8x128xf32>
    %c4_i32 = arith.constant 4 : i32
    %79 = vector.broadcast %c4_i32 : i32 to vector<8x128xi32>
    %80 = arith.andi %55, %79 : vector<8x128xi32>
    %c0_i32_22 = arith.constant 0 : i32
    %81 = vector.broadcast %c0_i32_22 : i32 to vector<8x128xi32>
    %82 = arith.cmpi eq, %80, %81 : vector<8x128xi32>
    %83 = arith.xori %82, %75 : vector<8x128xi1>
    %cst_23 = arith.constant dense<true> : vector<8x128xi1>
    %84 = arith.xori %83, %cst_23 : vector<8x128xi1>
    %85 = arith.minimumf %71, %78 : vector<8x128xf32>
    %86 = arith.maximumf %71, %78 : vector<8x128xf32>
    %87 = arith.select %84, %85, %86 : vector<8x128xi1>, vector<8x128xf32>
    %c1_i32_24 = arith.constant 1 : i32
    %88 = vector.broadcast %c1_i32_24 : i32 to vector<8x128xi32>
    %89 = arith.andi %55, %88 : vector<8x128xi32>
    %c0_i32_25 = arith.constant 0 : i32
    %90 = vector.broadcast %c0_i32_25 : i32 to vector<8x128xi32>
    %91 = arith.cmpi eq, %89, %90 : vector<8x128xi32>
    %c127_i32_26 = arith.constant 127 : i32
    %92 = tpu.dynamic_rotate %87 by %c127_i32_26 dim 1 : vector<8x128xf32>, i32 -> vector<8x128xf32>
    %c1_i32_27 = arith.constant 1 : i32
    %93 = tpu.dynamic_rotate %87 by %c1_i32_27 dim 1 : vector<8x128xf32>, i32 -> vector<8x128xf32>
    %94 = arith.select %91, %92, %93 : vector<8x128xi1>, vector<8x128xf32>
    %c4_i32_28 = arith.constant 4 : i32
    %95 = vector.broadcast %c4_i32_28 : i32 to vector<8x128xi32>
    %96 = arith.andi %55, %95 : vector<8x128xi32>
    %c0_i32_29 = arith.constant 0 : i32
    %97 = vector.broadcast %c0_i32_29 : i32 to vector<8x128xi32>
    %98 = arith.cmpi eq, %96, %97 : vector<8x128xi32>
    %99 = arith.xori %98, %91 : vector<8x128xi1>
    %cst_30 = arith.constant dense<true> : vector<8x128xi1>
    %100 = arith.xori %99, %cst_30 : vector<8x128xi1>
    %101 = arith.minimumf %87, %94 : vector<8x128xf32>
    %102 = arith.maximumf %87, %94 : vector<8x128xf32>
    %103 = arith.select %100, %101, %102 : vector<8x128xi1>, vector<8x128xf32>
    %c4_i32_31 = arith.constant 4 : i32
    %104 = vector.broadcast %c4_i32_31 : i32 to vector<8x128xi32>
    %105 = arith.andi %55, %104 : vector<8x128xi32>
    %c0_i32_32 = arith.constant 0 : i32
    %106 = vector.broadcast %c0_i32_32 : i32 to vector<8x128xi32>
    %107 = arith.cmpi eq, %105, %106 : vector<8x128xi32>
    %c124_i32 = arith.constant 124 : i32
    %108 = tpu.dynamic_rotate %103 by %c124_i32 dim 1 : vector<8x128xf32>, i32 -> vector<8x128xf32>
    %c4_i32_33 = arith.constant 4 : i32
    %109 = tpu.dynamic_rotate %103 by %c4_i32_33 dim 1 : vector<8x128xf32>, i32 -> vector<8x128xf32>
    %110 = arith.select %107, %108, %109 : vector<8x128xi1>, vector<8x128xf32>
    %c8_i32_34 = arith.constant 8 : i32
    %111 = vector.broadcast %c8_i32_34 : i32 to vector<8x128xi32>
    %112 = arith.andi %55, %111 : vector<8x128xi32>
    %c0_i32_35 = arith.constant 0 : i32
    %113 = vector.broadcast %c0_i32_35 : i32 to vector<8x128xi32>
    %114 = arith.cmpi eq, %112, %113 : vector<8x128xi32>
    %115 = arith.xori %114, %107 : vector<8x128xi1>
    %cst_36 = arith.constant dense<true> : vector<8x128xi1>
    %116 = arith.xori %115, %cst_36 : vector<8x128xi1>
    %117 = arith.minimumf %103, %110 : vector<8x128xf32>
    %118 = arith.maximumf %103, %110 : vector<8x128xf32>
    %119 = arith.select %116, %117, %118 : vector<8x128xi1>, vector<8x128xf32>
    %c2_i32_37 = arith.constant 2 : i32
    %120 = vector.broadcast %c2_i32_37 : i32 to vector<8x128xi32>
    %121 = arith.andi %55, %120 : vector<8x128xi32>
    %c0_i32_38 = arith.constant 0 : i32
    %122 = vector.broadcast %c0_i32_38 : i32 to vector<8x128xi32>
    %123 = arith.cmpi eq, %121, %122 : vector<8x128xi32>
    %c126_i32_39 = arith.constant 126 : i32
    %124 = tpu.dynamic_rotate %119 by %c126_i32_39 dim 1 : vector<8x128xf32>, i32 -> vector<8x128xf32>
    %c2_i32_40 = arith.constant 2 : i32
    %125 = tpu.dynamic_rotate %119 by %c2_i32_40 dim 1 : vector<8x128xf32>, i32 -> vector<8x128xf32>
    %126 = arith.select %123, %124, %125 : vector<8x128xi1>, vector<8x128xf32>
    %c8_i32_41 = arith.constant 8 : i32
    %127 = vector.broadcast %c8_i32_41 : i32 to vector<8x128xi32>
    %128 = arith.andi %55, %127 : vector<8x128xi32>
    %c0_i32_42 = arith.constant 0 : i32
    %129 = vector.broadcast %c0_i32_42 : i32 to vector<8x128xi32>
    %130 = arith.cmpi eq, %128, %129 : vector<8x128xi32>
    %131 = arith.xori %130, %123 : vector<8x128xi1>
    %cst_43 = arith.constant dense<true> : vector<8x128xi1>
    %132 = arith.xori %131, %cst_43 : vector<8x128xi1>
    %133 = arith.minimumf %119, %126 : vector<8x128xf32>
    %134 = arith.maximumf %119, %126 : vector<8x128xf32>
    %135 = arith.select %132, %133, %134 : vector<8x128xi1>, vector<8x128xf32>
    %c1_i32_44 = arith.constant 1 : i32
    %136 = vector.broadcast %c1_i32_44 : i32 to vector<8x128xi32>
    %137 = arith.andi %55, %136 : vector<8x128xi32>
    %c0_i32_45 = arith.constant 0 : i32
    %138 = vector.broadcast %c0_i32_45 : i32 to vector<8x128xi32>
    %139 = arith.cmpi eq, %137, %138 : vector<8x128xi32>
    %c127_i32_46 = arith.constant 127 : i32
    %140 = tpu.dynamic_rotate %135 by %c127_i32_46 dim 1 : vector<8x128xf32>, i32 -> vector<8x128xf32>
    %c1_i32_47 = arith.constant 1 : i32
    %141 = tpu.dynamic_rotate %135 by %c1_i32_47 dim 1 : vector<8x128xf32>, i32 -> vector<8x128xf32>
    %142 = arith.select %139, %140, %141 : vector<8x128xi1>, vector<8x128xf32>
    %c8_i32_48 = arith.constant 8 : i32
    %143 = vector.broadcast %c8_i32_48 : i32 to vector<8x128xi32>
    %144 = arith.andi %55, %143 : vector<8x128xi32>
    %c0_i32_49 = arith.constant 0 : i32
    %145 = vector.broadcast %c0_i32_49 : i32 to vector<8x128xi32>
    %146 = arith.cmpi eq, %144, %145 : vector<8x128xi32>
    %147 = arith.xori %146, %139 : vector<8x128xi1>
    %cst_50 = arith.constant dense<true> : vector<8x128xi1>
    %148 = arith.xori %147, %cst_50 : vector<8x128xi1>
    %149 = arith.minimumf %135, %142 : vector<8x128xf32>
    %150 = arith.maximumf %135, %142 : vector<8x128xf32>
    %151 = arith.select %148, %149, %150 : vector<8x128xi1>, vector<8x128xf32>
    %c8_i32_51 = arith.constant 8 : i32
    %152 = vector.broadcast %c8_i32_51 : i32 to vector<8x128xi32>
    %153 = arith.andi %55, %152 : vector<8x128xi32>
    %c0_i32_52 = arith.constant 0 : i32
    %154 = vector.broadcast %c0_i32_52 : i32 to vector<8x128xi32>
    %155 = arith.cmpi eq, %153, %154 : vector<8x128xi32>
    %c120_i32 = arith.constant 120 : i32
    %156 = tpu.dynamic_rotate %151 by %c120_i32 dim 1 : vector<8x128xf32>, i32 -> vector<8x128xf32>
    %c8_i32_53 = arith.constant 8 : i32
    %157 = tpu.dynamic_rotate %151 by %c8_i32_53 dim 1 : vector<8x128xf32>, i32 -> vector<8x128xf32>
    %158 = arith.select %155, %156, %157 : vector<8x128xi1>, vector<8x128xf32>
    %c16_i32 = arith.constant 16 : i32
    %159 = vector.broadcast %c16_i32 : i32 to vector<8x128xi32>
    %160 = arith.andi %55, %159 : vector<8x128xi32>
    %c0_i32_54 = arith.constant 0 : i32
    %161 = vector.broadcast %c0_i32_54 : i32 to vector<8x128xi32>
    %162 = arith.cmpi eq, %160, %161 : vector<8x128xi32>
    %163 = arith.xori %162, %155 : vector<8x128xi1>
    %cst_55 = arith.constant dense<true> : vector<8x128xi1>
    %164 = arith.xori %163, %cst_55 : vector<8x128xi1>
    %165 = arith.minimumf %151, %158 : vector<8x128xf32>
    %166 = arith.maximumf %151, %158 : vector<8x128xf32>
    %167 = arith.select %164, %165, %166 : vector<8x128xi1>, vector<8x128xf32>
    %c4_i32_56 = arith.constant 4 : i32
    %168 = vector.broadcast %c4_i32_56 : i32 to vector<8x128xi32>
    %169 = arith.andi %55, %168 : vector<8x128xi32>
    %c0_i32_57 = arith.constant 0 : i32
    %170 = vector.broadcast %c0_i32_57 : i32 to vector<8x128xi32>
    %171 = arith.cmpi eq, %169, %170 : vector<8x128xi32>
    %c124_i32_58 = arith.constant 124 : i32
    %172 = tpu.dynamic_rotate %167 by %c124_i32_58 dim 1 : vector<8x128xf32>, i32 -> vector<8x128xf32>
    %c4_i32_59 = arith.constant 4 : i32
    %173 = tpu.dynamic_rotate %167 by %c4_i32_59 dim 1 : vector<8x128xf32>, i32 -> vector<8x128xf32>
    %174 = arith.select %171, %172, %173 : vector<8x128xi1>, vector<8x128xf32>
    %c16_i32_60 = arith.constant 16 : i32
    %175 = vector.broadcast %c16_i32_60 : i32 to vector<8x128xi32>
    %176 = arith.andi %55, %175 : vector<8x128xi32>
    %c0_i32_61 = arith.constant 0 : i32
    %177 = vector.broadcast %c0_i32_61 : i32 to vector<8x128xi32>
    %178 = arith.cmpi eq, %176, %177 : vector<8x128xi32>
    %179 = arith.xori %178, %171 : vector<8x128xi1>
    %cst_62 = arith.constant dense<true> : vector<8x128xi1>
    %180 = arith.xori %179, %cst_62 : vector<8x128xi1>
    %181 = arith.minimumf %167, %174 : vector<8x128xf32>
    %182 = arith.maximumf %167, %174 : vector<8x128xf32>
    %183 = arith.select %180, %181, %182 : vector<8x128xi1>, vector<8x128xf32>
    %c2_i32_63 = arith.constant 2 : i32
    %184 = vector.broadcast %c2_i32_63 : i32 to vector<8x128xi32>
    %185 = arith.andi %55, %184 : vector<8x128xi32>
    %c0_i32_64 = arith.constant 0 : i32
    %186 = vector.broadcast %c0_i32_64 : i32 to vector<8x128xi32>
    %187 = arith.cmpi eq, %185, %186 : vector<8x128xi32>
    %c126_i32_65 = arith.constant 126 : i32
    %188 = tpu.dynamic_rotate %183 by %c126_i32_65 dim 1 : vector<8x128xf32>, i32 -> vector<8x128xf32>
    %c2_i32_66 = arith.constant 2 : i32
    %189 = tpu.dynamic_rotate %183 by %c2_i32_66 dim 1 : vector<8x128xf32>, i32 -> vector<8x128xf32>
    %190 = arith.select %187, %188, %189 : vector<8x128xi1>, vector<8x128xf32>
    %c16_i32_67 = arith.constant 16 : i32
    %191 = vector.broadcast %c16_i32_67 : i32 to vector<8x128xi32>
    %192 = arith.andi %55, %191 : vector<8x128xi32>
    %c0_i32_68 = arith.constant 0 : i32
    %193 = vector.broadcast %c0_i32_68 : i32 to vector<8x128xi32>
    %194 = arith.cmpi eq, %192, %193 : vector<8x128xi32>
    %195 = arith.xori %194, %187 : vector<8x128xi1>
    %cst_69 = arith.constant dense<true> : vector<8x128xi1>
    %196 = arith.xori %195, %cst_69 : vector<8x128xi1>
    %197 = arith.minimumf %183, %190 : vector<8x128xf32>
    %198 = arith.maximumf %183, %190 : vector<8x128xf32>
    %199 = arith.select %196, %197, %198 : vector<8x128xi1>, vector<8x128xf32>
    %c1_i32_70 = arith.constant 1 : i32
    %200 = vector.broadcast %c1_i32_70 : i32 to vector<8x128xi32>
    %201 = arith.andi %55, %200 : vector<8x128xi32>
    %c0_i32_71 = arith.constant 0 : i32
    %202 = vector.broadcast %c0_i32_71 : i32 to vector<8x128xi32>
    %203 = arith.cmpi eq, %201, %202 : vector<8x128xi32>
    %c127_i32_72 = arith.constant 127 : i32
    %204 = tpu.dynamic_rotate %199 by %c127_i32_72 dim 1 : vector<8x128xf32>, i32 -> vector<8x128xf32>
    %c1_i32_73 = arith.constant 1 : i32
    %205 = tpu.dynamic_rotate %199 by %c1_i32_73 dim 1 : vector<8x128xf32>, i32 -> vector<8x128xf32>
    %206 = arith.select %203, %204, %205 : vector<8x128xi1>, vector<8x128xf32>
    %c16_i32_74 = arith.constant 16 : i32
    %207 = vector.broadcast %c16_i32_74 : i32 to vector<8x128xi32>
    %208 = arith.andi %55, %207 : vector<8x128xi32>
    %c0_i32_75 = arith.constant 0 : i32
    %209 = vector.broadcast %c0_i32_75 : i32 to vector<8x128xi32>
    %210 = arith.cmpi eq, %208, %209 : vector<8x128xi32>
    %211 = arith.xori %210, %203 : vector<8x128xi1>
    %cst_76 = arith.constant dense<true> : vector<8x128xi1>
    %212 = arith.xori %211, %cst_76 : vector<8x128xi1>
    %213 = arith.minimumf %199, %206 : vector<8x128xf32>
    %214 = arith.maximumf %199, %206 : vector<8x128xf32>
    %215 = arith.select %212, %213, %214 : vector<8x128xi1>, vector<8x128xf32>
    %c16_i32_77 = arith.constant 16 : i32
    %216 = vector.broadcast %c16_i32_77 : i32 to vector<8x128xi32>
    %217 = arith.andi %55, %216 : vector<8x128xi32>
    %c0_i32_78 = arith.constant 0 : i32
    %218 = vector.broadcast %c0_i32_78 : i32 to vector<8x128xi32>
    %219 = arith.cmpi eq, %217, %218 : vector<8x128xi32>
    %c112_i32 = arith.constant 112 : i32
    %220 = tpu.dynamic_rotate %215 by %c112_i32 dim 1 : vector<8x128xf32>, i32 -> vector<8x128xf32>
    %c16_i32_79 = arith.constant 16 : i32
    %221 = tpu.dynamic_rotate %215 by %c16_i32_79 dim 1 : vector<8x128xf32>, i32 -> vector<8x128xf32>
    %222 = arith.select %219, %220, %221 : vector<8x128xi1>, vector<8x128xf32>
    %c32_i32 = arith.constant 32 : i32
    %223 = vector.broadcast %c32_i32 : i32 to vector<8x128xi32>
    %224 = arith.andi %55, %223 : vector<8x128xi32>
    %c0_i32_80 = arith.constant 0 : i32
    %225 = vector.broadcast %c0_i32_80 : i32 to vector<8x128xi32>
    %226 = arith.cmpi eq, %224, %225 : vector<8x128xi32>
    %227 = arith.xori %226, %219 : vector<8x128xi1>
    %cst_81 = arith.constant dense<true> : vector<8x128xi1>
    %228 = arith.xori %227, %cst_81 : vector<8x128xi1>
    %229 = arith.minimumf %215, %222 : vector<8x128xf32>
    %230 = arith.maximumf %215, %222 : vector<8x128xf32>
    %231 = arith.select %228, %229, %230 : vector<8x128xi1>, vector<8x128xf32>
    %c8_i32_82 = arith.constant 8 : i32
    %232 = vector.broadcast %c8_i32_82 : i32 to vector<8x128xi32>
    %233 = arith.andi %55, %232 : vector<8x128xi32>
    %c0_i32_83 = arith.constant 0 : i32
    %234 = vector.broadcast %c0_i32_83 : i32 to vector<8x128xi32>
    %235 = arith.cmpi eq, %233, %234 : vector<8x128xi32>
    %c120_i32_84 = arith.constant 120 : i32
    %236 = tpu.dynamic_rotate %231 by %c120_i32_84 dim 1 : vector<8x128xf32>, i32 -> vector<8x128xf32>
    %c8_i32_85 = arith.constant 8 : i32
    %237 = tpu.dynamic_rotate %231 by %c8_i32_85 dim 1 : vector<8x128xf32>, i32 -> vector<8x128xf32>
    %238 = arith.select %235, %236, %237 : vector<8x128xi1>, vector<8x128xf32>
    %c32_i32_86 = arith.constant 32 : i32
    %239 = vector.broadcast %c32_i32_86 : i32 to vector<8x128xi32>
    %240 = arith.andi %55, %239 : vector<8x128xi32>
    %c0_i32_87 = arith.constant 0 : i32
    %241 = vector.broadcast %c0_i32_87 : i32 to vector<8x128xi32>
    %242 = arith.cmpi eq, %240, %241 : vector<8x128xi32>
    %243 = arith.xori %242, %235 : vector<8x128xi1>
    %cst_88 = arith.constant dense<true> : vector<8x128xi1>
    %244 = arith.xori %243, %cst_88 : vector<8x128xi1>
    %245 = arith.minimumf %231, %238 : vector<8x128xf32>
    %246 = arith.maximumf %231, %238 : vector<8x128xf32>
    %247 = arith.select %244, %245, %246 : vector<8x128xi1>, vector<8x128xf32>
    %c4_i32_89 = arith.constant 4 : i32
    %248 = vector.broadcast %c4_i32_89 : i32 to vector<8x128xi32>
    %249 = arith.andi %55, %248 : vector<8x128xi32>
    %c0_i32_90 = arith.constant 0 : i32
    %250 = vector.broadcast %c0_i32_90 : i32 to vector<8x128xi32>
    %251 = arith.cmpi eq, %249, %250 : vector<8x128xi32>
    %c124_i32_91 = arith.constant 124 : i32
    %252 = tpu.dynamic_rotate %247 by %c124_i32_91 dim 1 : vector<8x128xf32>, i32 -> vector<8x128xf32>
    %c4_i32_92 = arith.constant 4 : i32
    %253 = tpu.dynamic_rotate %247 by %c4_i32_92 dim 1 : vector<8x128xf32>, i32 -> vector<8x128xf32>
    %254 = arith.select %251, %252, %253 : vector<8x128xi1>, vector<8x128xf32>
    %c32_i32_93 = arith.constant 32 : i32
    %255 = vector.broadcast %c32_i32_93 : i32 to vector<8x128xi32>
    %256 = arith.andi %55, %255 : vector<8x128xi32>
    %c0_i32_94 = arith.constant 0 : i32
    %257 = vector.broadcast %c0_i32_94 : i32 to vector<8x128xi32>
    %258 = arith.cmpi eq, %256, %257 : vector<8x128xi32>
    %259 = arith.xori %258, %251 : vector<8x128xi1>
    %cst_95 = arith.constant dense<true> : vector<8x128xi1>
    %260 = arith.xori %259, %cst_95 : vector<8x128xi1>
    %261 = arith.minimumf %247, %254 : vector<8x128xf32>
    %262 = arith.maximumf %247, %254 : vector<8x128xf32>
    %263 = arith.select %260, %261, %262 : vector<8x128xi1>, vector<8x128xf32>
    %c2_i32_96 = arith.constant 2 : i32
    %264 = vector.broadcast %c2_i32_96 : i32 to vector<8x128xi32>
    %265 = arith.andi %55, %264 : vector<8x128xi32>
    %c0_i32_97 = arith.constant 0 : i32
    %266 = vector.broadcast %c0_i32_97 : i32 to vector<8x128xi32>
    %267 = arith.cmpi eq, %265, %266 : vector<8x128xi32>
    %c126_i32_98 = arith.constant 126 : i32
    %268 = tpu.dynamic_rotate %263 by %c126_i32_98 dim 1 : vector<8x128xf32>, i32 -> vector<8x128xf32>
    %c2_i32_99 = arith.constant 2 : i32
    %269 = tpu.dynamic_rotate %263 by %c2_i32_99 dim 1 : vector<8x128xf32>, i32 -> vector<8x128xf32>
    %270 = arith.select %267, %268, %269 : vector<8x128xi1>, vector<8x128xf32>
    %c32_i32_100 = arith.constant 32 : i32
    %271 = vector.broadcast %c32_i32_100 : i32 to vector<8x128xi32>
    %272 = arith.andi %55, %271 : vector<8x128xi32>
    %c0_i32_101 = arith.constant 0 : i32
    %273 = vector.broadcast %c0_i32_101 : i32 to vector<8x128xi32>
    %274 = arith.cmpi eq, %272, %273 : vector<8x128xi32>
    %275 = arith.xori %274, %267 : vector<8x128xi1>
    %cst_102 = arith.constant dense<true> : vector<8x128xi1>
    %276 = arith.xori %275, %cst_102 : vector<8x128xi1>
    %277 = arith.minimumf %263, %270 : vector<8x128xf32>
    %278 = arith.maximumf %263, %270 : vector<8x128xf32>
    %279 = arith.select %276, %277, %278 : vector<8x128xi1>, vector<8x128xf32>
    %c1_i32_103 = arith.constant 1 : i32
    %280 = vector.broadcast %c1_i32_103 : i32 to vector<8x128xi32>
    %281 = arith.andi %55, %280 : vector<8x128xi32>
    %c0_i32_104 = arith.constant 0 : i32
    %282 = vector.broadcast %c0_i32_104 : i32 to vector<8x128xi32>
    %283 = arith.cmpi eq, %281, %282 : vector<8x128xi32>
    %c127_i32_105 = arith.constant 127 : i32
    %284 = tpu.dynamic_rotate %279 by %c127_i32_105 dim 1 : vector<8x128xf32>, i32 -> vector<8x128xf32>
    %c1_i32_106 = arith.constant 1 : i32
    %285 = tpu.dynamic_rotate %279 by %c1_i32_106 dim 1 : vector<8x128xf32>, i32 -> vector<8x128xf32>
    %286 = arith.select %283, %284, %285 : vector<8x128xi1>, vector<8x128xf32>
    %c32_i32_107 = arith.constant 32 : i32
    %287 = vector.broadcast %c32_i32_107 : i32 to vector<8x128xi32>
    %288 = arith.andi %55, %287 : vector<8x128xi32>
    %c0_i32_108 = arith.constant 0 : i32
    %289 = vector.broadcast %c0_i32_108 : i32 to vector<8x128xi32>
    %290 = arith.cmpi eq, %288, %289 : vector<8x128xi32>
    %291 = arith.xori %290, %283 : vector<8x128xi1>
    %cst_109 = arith.constant dense<true> : vector<8x128xi1>
    %292 = arith.xori %291, %cst_109 : vector<8x128xi1>
    %293 = arith.minimumf %279, %286 : vector<8x128xf32>
    %294 = arith.maximumf %279, %286 : vector<8x128xf32>
    %295 = arith.select %292, %293, %294 : vector<8x128xi1>, vector<8x128xf32>
    %c32_i32_110 = arith.constant 32 : i32
    %296 = vector.broadcast %c32_i32_110 : i32 to vector<8x128xi32>
    %297 = arith.andi %55, %296 : vector<8x128xi32>
    %c0_i32_111 = arith.constant 0 : i32
    %298 = vector.broadcast %c0_i32_111 : i32 to vector<8x128xi32>
    %299 = arith.cmpi eq, %297, %298 : vector<8x128xi32>
    %c96_i32 = arith.constant 96 : i32
    %300 = tpu.dynamic_rotate %295 by %c96_i32 dim 1 : vector<8x128xf32>, i32 -> vector<8x128xf32>
    %c32_i32_112 = arith.constant 32 : i32
    %301 = tpu.dynamic_rotate %295 by %c32_i32_112 dim 1 : vector<8x128xf32>, i32 -> vector<8x128xf32>
    %302 = arith.select %299, %300, %301 : vector<8x128xi1>, vector<8x128xf32>
    %c64_i32 = arith.constant 64 : i32
    %303 = vector.broadcast %c64_i32 : i32 to vector<8x128xi32>
    %304 = arith.andi %55, %303 : vector<8x128xi32>
    %c0_i32_113 = arith.constant 0 : i32
    %305 = vector.broadcast %c0_i32_113 : i32 to vector<8x128xi32>
    %306 = arith.cmpi eq, %304, %305 : vector<8x128xi32>
    %307 = arith.xori %306, %299 : vector<8x128xi1>
    %cst_114 = arith.constant dense<true> : vector<8x128xi1>
    %308 = arith.xori %307, %cst_114 : vector<8x128xi1>
    %309 = arith.minimumf %295, %302 : vector<8x128xf32>
    %310 = arith.maximumf %295, %302 : vector<8x128xf32>
    %311 = arith.select %308, %309, %310 : vector<8x128xi1>, vector<8x128xf32>
    %c16_i32_115 = arith.constant 16 : i32
    %312 = vector.broadcast %c16_i32_115 : i32 to vector<8x128xi32>
    %313 = arith.andi %55, %312 : vector<8x128xi32>
    %c0_i32_116 = arith.constant 0 : i32
    %314 = vector.broadcast %c0_i32_116 : i32 to vector<8x128xi32>
    %315 = arith.cmpi eq, %313, %314 : vector<8x128xi32>
    %c112_i32_117 = arith.constant 112 : i32
    %316 = tpu.dynamic_rotate %311 by %c112_i32_117 dim 1 : vector<8x128xf32>, i32 -> vector<8x128xf32>
    %c16_i32_118 = arith.constant 16 : i32
    %317 = tpu.dynamic_rotate %311 by %c16_i32_118 dim 1 : vector<8x128xf32>, i32 -> vector<8x128xf32>
    %318 = arith.select %315, %316, %317 : vector<8x128xi1>, vector<8x128xf32>
    %c64_i32_119 = arith.constant 64 : i32
    %319 = vector.broadcast %c64_i32_119 : i32 to vector<8x128xi32>
    %320 = arith.andi %55, %319 : vector<8x128xi32>
    %c0_i32_120 = arith.constant 0 : i32
    %321 = vector.broadcast %c0_i32_120 : i32 to vector<8x128xi32>
    %322 = arith.cmpi eq, %320, %321 : vector<8x128xi32>
    %323 = arith.xori %322, %315 : vector<8x128xi1>
    %cst_121 = arith.constant dense<true> : vector<8x128xi1>
    %324 = arith.xori %323, %cst_121 : vector<8x128xi1>
    %325 = arith.minimumf %311, %318 : vector<8x128xf32>
    %326 = arith.maximumf %311, %318 : vector<8x128xf32>
    %327 = arith.select %324, %325, %326 : vector<8x128xi1>, vector<8x128xf32>
    %c8_i32_122 = arith.constant 8 : i32
    %328 = vector.broadcast %c8_i32_122 : i32 to vector<8x128xi32>
    %329 = arith.andi %55, %328 : vector<8x128xi32>
    %c0_i32_123 = arith.constant 0 : i32
    %330 = vector.broadcast %c0_i32_123 : i32 to vector<8x128xi32>
    %331 = arith.cmpi eq, %329, %330 : vector<8x128xi32>
    %c120_i32_124 = arith.constant 120 : i32
    %332 = tpu.dynamic_rotate %327 by %c120_i32_124 dim 1 : vector<8x128xf32>, i32 -> vector<8x128xf32>
    %c8_i32_125 = arith.constant 8 : i32
    %333 = tpu.dynamic_rotate %327 by %c8_i32_125 dim 1 : vector<8x128xf32>, i32 -> vector<8x128xf32>
    %334 = arith.select %331, %332, %333 : vector<8x128xi1>, vector<8x128xf32>
    %c64_i32_126 = arith.constant 64 : i32
    %335 = vector.broadcast %c64_i32_126 : i32 to vector<8x128xi32>
    %336 = arith.andi %55, %335 : vector<8x128xi32>
    %c0_i32_127 = arith.constant 0 : i32
    %337 = vector.broadcast %c0_i32_127 : i32 to vector<8x128xi32>
    %338 = arith.cmpi eq, %336, %337 : vector<8x128xi32>
    %339 = arith.xori %338, %331 : vector<8x128xi1>
    %cst_128 = arith.constant dense<true> : vector<8x128xi1>
    %340 = arith.xori %339, %cst_128 : vector<8x128xi1>
    %341 = arith.minimumf %327, %334 : vector<8x128xf32>
    %342 = arith.maximumf %327, %334 : vector<8x128xf32>
    %343 = arith.select %340, %341, %342 : vector<8x128xi1>, vector<8x128xf32>
    %c4_i32_129 = arith.constant 4 : i32
    %344 = vector.broadcast %c4_i32_129 : i32 to vector<8x128xi32>
    %345 = arith.andi %55, %344 : vector<8x128xi32>
    %c0_i32_130 = arith.constant 0 : i32
    %346 = vector.broadcast %c0_i32_130 : i32 to vector<8x128xi32>
    %347 = arith.cmpi eq, %345, %346 : vector<8x128xi32>
    %c124_i32_131 = arith.constant 124 : i32
    %348 = tpu.dynamic_rotate %343 by %c124_i32_131 dim 1 : vector<8x128xf32>, i32 -> vector<8x128xf32>
    %c4_i32_132 = arith.constant 4 : i32
    %349 = tpu.dynamic_rotate %343 by %c4_i32_132 dim 1 : vector<8x128xf32>, i32 -> vector<8x128xf32>
    %350 = arith.select %347, %348, %349 : vector<8x128xi1>, vector<8x128xf32>
    %c64_i32_133 = arith.constant 64 : i32
    %351 = vector.broadcast %c64_i32_133 : i32 to vector<8x128xi32>
    %352 = arith.andi %55, %351 : vector<8x128xi32>
    %c0_i32_134 = arith.constant 0 : i32
    %353 = vector.broadcast %c0_i32_134 : i32 to vector<8x128xi32>
    %354 = arith.cmpi eq, %352, %353 : vector<8x128xi32>
    %355 = arith.xori %354, %347 : vector<8x128xi1>
    %cst_135 = arith.constant dense<true> : vector<8x128xi1>
    %356 = arith.xori %355, %cst_135 : vector<8x128xi1>
    %357 = arith.minimumf %343, %350 : vector<8x128xf32>
    %358 = arith.maximumf %343, %350 : vector<8x128xf32>
    %359 = arith.select %356, %357, %358 : vector<8x128xi1>, vector<8x128xf32>
    %c2_i32_136 = arith.constant 2 : i32
    %360 = vector.broadcast %c2_i32_136 : i32 to vector<8x128xi32>
    %361 = arith.andi %55, %360 : vector<8x128xi32>
    %c0_i32_137 = arith.constant 0 : i32
    %362 = vector.broadcast %c0_i32_137 : i32 to vector<8x128xi32>
    %363 = arith.cmpi eq, %361, %362 : vector<8x128xi32>
    %c126_i32_138 = arith.constant 126 : i32
    %364 = tpu.dynamic_rotate %359 by %c126_i32_138 dim 1 : vector<8x128xf32>, i32 -> vector<8x128xf32>
    %c2_i32_139 = arith.constant 2 : i32
    %365 = tpu.dynamic_rotate %359 by %c2_i32_139 dim 1 : vector<8x128xf32>, i32 -> vector<8x128xf32>
    %366 = arith.select %363, %364, %365 : vector<8x128xi1>, vector<8x128xf32>
    %c64_i32_140 = arith.constant 64 : i32
    %367 = vector.broadcast %c64_i32_140 : i32 to vector<8x128xi32>
    %368 = arith.andi %55, %367 : vector<8x128xi32>
    %c0_i32_141 = arith.constant 0 : i32
    %369 = vector.broadcast %c0_i32_141 : i32 to vector<8x128xi32>
    %370 = arith.cmpi eq, %368, %369 : vector<8x128xi32>
    %371 = arith.xori %370, %363 : vector<8x128xi1>
    %cst_142 = arith.constant dense<true> : vector<8x128xi1>
    %372 = arith.xori %371, %cst_142 : vector<8x128xi1>
    %373 = arith.minimumf %359, %366 : vector<8x128xf32>
    %374 = arith.maximumf %359, %366 : vector<8x128xf32>
    %375 = arith.select %372, %373, %374 : vector<8x128xi1>, vector<8x128xf32>
    %c1_i32_143 = arith.constant 1 : i32
    %376 = vector.broadcast %c1_i32_143 : i32 to vector<8x128xi32>
    %377 = arith.andi %55, %376 : vector<8x128xi32>
    %c0_i32_144 = arith.constant 0 : i32
    %378 = vector.broadcast %c0_i32_144 : i32 to vector<8x128xi32>
    %379 = arith.cmpi eq, %377, %378 : vector<8x128xi32>
    %c127_i32_145 = arith.constant 127 : i32
    %380 = tpu.dynamic_rotate %375 by %c127_i32_145 dim 1 : vector<8x128xf32>, i32 -> vector<8x128xf32>
    %c1_i32_146 = arith.constant 1 : i32
    %381 = tpu.dynamic_rotate %375 by %c1_i32_146 dim 1 : vector<8x128xf32>, i32 -> vector<8x128xf32>
    %382 = arith.select %379, %380, %381 : vector<8x128xi1>, vector<8x128xf32>
    %c64_i32_147 = arith.constant 64 : i32
    %383 = vector.broadcast %c64_i32_147 : i32 to vector<8x128xi32>
    %384 = arith.andi %55, %383 : vector<8x128xi32>
    %c0_i32_148 = arith.constant 0 : i32
    %385 = vector.broadcast %c0_i32_148 : i32 to vector<8x128xi32>
    %386 = arith.cmpi eq, %384, %385 : vector<8x128xi32>
    %387 = arith.xori %386, %379 : vector<8x128xi1>
    %cst_149 = arith.constant dense<true> : vector<8x128xi1>
    %388 = arith.xori %387, %cst_149 : vector<8x128xi1>
    %389 = arith.minimumf %375, %382 : vector<8x128xf32>
    %390 = arith.maximumf %375, %382 : vector<8x128xf32>
    %391 = arith.select %388, %389, %390 : vector<8x128xi1>, vector<8x128xf32>
    %c64_i32_150 = arith.constant 64 : i32
    %392 = vector.broadcast %c64_i32_150 : i32 to vector<8x128xi32>
    %393 = arith.andi %55, %392 : vector<8x128xi32>
    %c0_i32_151 = arith.constant 0 : i32
    %394 = vector.broadcast %c0_i32_151 : i32 to vector<8x128xi32>
    %395 = arith.cmpi eq, %393, %394 : vector<8x128xi32>
    %c64_i32_152 = arith.constant 64 : i32
    %396 = tpu.dynamic_rotate %391 by %c64_i32_152 dim 1 : vector<8x128xf32>, i32 -> vector<8x128xf32>
    %c64_i32_153 = arith.constant 64 : i32
    %397 = tpu.dynamic_rotate %391 by %c64_i32_153 dim 1 : vector<8x128xf32>, i32 -> vector<8x128xf32>
    %398 = arith.select %395, %396, %397 : vector<8x128xi1>, vector<8x128xf32>
    %399 = arith.minimumf %391, %398 : vector<8x128xf32>
    %400 = arith.maximumf %391, %398 : vector<8x128xf32>
    %401 = arith.select %395, %399, %400 : vector<8x128xi1>, vector<8x128xf32>
    %c32_i32_154 = arith.constant 32 : i32
    %402 = vector.broadcast %c32_i32_154 : i32 to vector<8x128xi32>
    %403 = arith.andi %55, %402 : vector<8x128xi32>
    %c0_i32_155 = arith.constant 0 : i32
    %404 = vector.broadcast %c0_i32_155 : i32 to vector<8x128xi32>
    %405 = arith.cmpi eq, %403, %404 : vector<8x128xi32>
    %c96_i32_156 = arith.constant 96 : i32
    %406 = tpu.dynamic_rotate %401 by %c96_i32_156 dim 1 : vector<8x128xf32>, i32 -> vector<8x128xf32>
    %c32_i32_157 = arith.constant 32 : i32
    %407 = tpu.dynamic_rotate %401 by %c32_i32_157 dim 1 : vector<8x128xf32>, i32 -> vector<8x128xf32>
    %408 = arith.select %405, %406, %407 : vector<8x128xi1>, vector<8x128xf32>
    %409 = arith.minimumf %401, %408 : vector<8x128xf32>
    %410 = arith.maximumf %401, %408 : vector<8x128xf32>
    %411 = arith.select %405, %409, %410 : vector<8x128xi1>, vector<8x128xf32>
    %c16_i32_158 = arith.constant 16 : i32
    %412 = vector.broadcast %c16_i32_158 : i32 to vector<8x128xi32>
    %413 = arith.andi %55, %412 : vector<8x128xi32>
    %c0_i32_159 = arith.constant 0 : i32
    %414 = vector.broadcast %c0_i32_159 : i32 to vector<8x128xi32>
    %415 = arith.cmpi eq, %413, %414 : vector<8x128xi32>
    %c112_i32_160 = arith.constant 112 : i32
    %416 = tpu.dynamic_rotate %411 by %c112_i32_160 dim 1 : vector<8x128xf32>, i32 -> vector<8x128xf32>
    %c16_i32_161 = arith.constant 16 : i32
    %417 = tpu.dynamic_rotate %411 by %c16_i32_161 dim 1 : vector<8x128xf32>, i32 -> vector<8x128xf32>
    %418 = arith.select %415, %416, %417 : vector<8x128xi1>, vector<8x128xf32>
    %419 = arith.minimumf %411, %418 : vector<8x128xf32>
    %420 = arith.maximumf %411, %418 : vector<8x128xf32>
    %421 = arith.select %415, %419, %420 : vector<8x128xi1>, vector<8x128xf32>
    %c8_i32_162 = arith.constant 8 : i32
    %422 = vector.broadcast %c8_i32_162 : i32 to vector<8x128xi32>
    %423 = arith.andi %55, %422 : vector<8x128xi32>
    %c0_i32_163 = arith.constant 0 : i32
    %424 = vector.broadcast %c0_i32_163 : i32 to vector<8x128xi32>
    %425 = arith.cmpi eq, %423, %424 : vector<8x128xi32>
    %c120_i32_164 = arith.constant 120 : i32
    %426 = tpu.dynamic_rotate %421 by %c120_i32_164 dim 1 : vector<8x128xf32>, i32 -> vector<8x128xf32>
    %c8_i32_165 = arith.constant 8 : i32
    %427 = tpu.dynamic_rotate %421 by %c8_i32_165 dim 1 : vector<8x128xf32>, i32 -> vector<8x128xf32>
    %428 = arith.select %425, %426, %427 : vector<8x128xi1>, vector<8x128xf32>
    %429 = arith.minimumf %421, %428 : vector<8x128xf32>
    %430 = arith.maximumf %421, %428 : vector<8x128xf32>
    %431 = arith.select %425, %429, %430 : vector<8x128xi1>, vector<8x128xf32>
    %c4_i32_166 = arith.constant 4 : i32
    %432 = vector.broadcast %c4_i32_166 : i32 to vector<8x128xi32>
    %433 = arith.andi %55, %432 : vector<8x128xi32>
    %c0_i32_167 = arith.constant 0 : i32
    %434 = vector.broadcast %c0_i32_167 : i32 to vector<8x128xi32>
    %435 = arith.cmpi eq, %433, %434 : vector<8x128xi32>
    %c124_i32_168 = arith.constant 124 : i32
    %436 = tpu.dynamic_rotate %431 by %c124_i32_168 dim 1 : vector<8x128xf32>, i32 -> vector<8x128xf32>
    %c4_i32_169 = arith.constant 4 : i32
    %437 = tpu.dynamic_rotate %431 by %c4_i32_169 dim 1 : vector<8x128xf32>, i32 -> vector<8x128xf32>
    %438 = arith.select %435, %436, %437 : vector<8x128xi1>, vector<8x128xf32>
    %439 = arith.minimumf %431, %438 : vector<8x128xf32>
    %440 = arith.maximumf %431, %438 : vector<8x128xf32>
    %441 = arith.select %435, %439, %440 : vector<8x128xi1>, vector<8x128xf32>
    %c2_i32_170 = arith.constant 2 : i32
    %442 = vector.broadcast %c2_i32_170 : i32 to vector<8x128xi32>
    %443 = arith.andi %55, %442 : vector<8x128xi32>
    %c0_i32_171 = arith.constant 0 : i32
    %444 = vector.broadcast %c0_i32_171 : i32 to vector<8x128xi32>
    %445 = arith.cmpi eq, %443, %444 : vector<8x128xi32>
    %c126_i32_172 = arith.constant 126 : i32
    %446 = tpu.dynamic_rotate %441 by %c126_i32_172 dim 1 : vector<8x128xf32>, i32 -> vector<8x128xf32>
    %c2_i32_173 = arith.constant 2 : i32
    %447 = tpu.dynamic_rotate %441 by %c2_i32_173 dim 1 : vector<8x128xf32>, i32 -> vector<8x128xf32>
    %448 = arith.select %445, %446, %447 : vector<8x128xi1>, vector<8x128xf32>
    %449 = arith.minimumf %441, %448 : vector<8x128xf32>
    %450 = arith.maximumf %441, %448 : vector<8x128xf32>
    %451 = arith.select %445, %449, %450 : vector<8x128xi1>, vector<8x128xf32>
    %c1_i32_174 = arith.constant 1 : i32
    %452 = vector.broadcast %c1_i32_174 : i32 to vector<8x128xi32>
    %453 = arith.andi %55, %452 : vector<8x128xi32>
    %c0_i32_175 = arith.constant 0 : i32
    %454 = vector.broadcast %c0_i32_175 : i32 to vector<8x128xi32>
    %455 = arith.cmpi eq, %453, %454 : vector<8x128xi32>
    %c127_i32_176 = arith.constant 127 : i32
    %456 = tpu.dynamic_rotate %451 by %c127_i32_176 dim 1 : vector<8x128xf32>, i32 -> vector<8x128xf32>
    %c1_i32_177 = arith.constant 1 : i32
    %457 = tpu.dynamic_rotate %451 by %c1_i32_177 dim 1 : vector<8x128xf32>, i32 -> vector<8x128xf32>
    %458 = arith.select %455, %456, %457 : vector<8x128xi1>, vector<8x128xf32>
    %459 = arith.minimumf %451, %458 : vector<8x128xf32>
    %460 = arith.maximumf %451, %458 : vector<8x128xf32>
    %461 = arith.select %455, %459, %460 : vector<8x128xi1>, vector<8x128xf32>
    %c116_i32 = arith.constant 116 : i32
    %462 = vector.broadcast %c116_i32 : i32 to vector<8x128xi32>
    %463 = arith.cmpi sge, %55, %462 : vector<8x128xi32>
    %cst_178 = arith.constant 0.000000e+00 : f32
    %464 = vector.broadcast %cst_178 : f32 to vector<8x128xf32>
    %465 = arith.select %463, %461, %464 : vector<8x128xi1>, vector<8x128xf32>
    %466 = vector.shape_cast %465 : vector<8x128xf32> to vector<1x8x128xf32>
    %cst_179 = arith.constant dense<0.000000e+00> : vector<1xf32>
    %467 = vector.multi_reduction <add>, %466, %cst_179 [1, 2] : vector<1x8x128xf32> to vector<1xf32>
    %468 = vector.shape_cast %467 : vector<1xf32> to vector<1x1x1xf32>
    %469 = vector.extract %468[0, 0, 0] : f32 from vector<1x1x1xf32>
    %470 = tpu.iota {dimensions = array<i32: 1>} : vector<1x8x128xi32>
    %471 = tpu.iota {dimensions = array<i32: 2>} : vector<1x8x128xi32>
    %c0_i32_180 = arith.constant 0 : i32
    %472 = vector.broadcast %c0_i32_180 : i32 to vector<1x8x128xi32>
    %473 = arith.cmpi eq, %470, %472 : vector<1x8x128xi32>
    %c0_i32_181 = arith.constant 0 : i32
    %474 = vector.broadcast %c0_i32_181 : i32 to vector<1x8x128xi32>
    %475 = arith.cmpi eq, %471, %474 : vector<1x8x128xi32>
    %476 = arith.andi %473, %475 : vector<1x8x128xi1>
    %c1_i32_182 = arith.constant 1 : i32
    %477 = vector.broadcast %c1_i32_182 : i32 to vector<1x8x128xi32>
    %478 = arith.cmpi eq, %471, %477 : vector<1x8x128xi32>
    %479 = arith.andi %473, %478 : vector<1x8x128xi1>
    %c2_i32_183 = arith.constant 2 : i32
    %480 = vector.broadcast %c2_i32_183 : i32 to vector<1x8x128xi32>
    %481 = arith.cmpi eq, %471, %480 : vector<1x8x128xi32>
    %482 = arith.andi %473, %481 : vector<1x8x128xi1>
    %cst_184 = arith.constant 0.000000e+00 : f32
    %483 = vector.broadcast %469 : f32 to vector<1x8x128xf32>
    %484 = vector.broadcast %cst_184 : f32 to vector<1x8x128xf32>
    %485 = arith.select %482, %483, %484 : vector<1x8x128xi1>, vector<1x8x128xf32>
    %486 = vector.broadcast %42 : f32 to vector<1x8x128xf32>
    %487 = arith.select %479, %486, %485 : vector<1x8x128xi1>, vector<1x8x128xf32>
    %488 = vector.broadcast %36 : f32 to vector<1x8x128xf32>
    %489 = arith.select %476, %488, %487 : vector<1x8x128xi1>, vector<1x8x128xf32>
    %c0_185 = arith.constant 0 : index
    %c0_186 = arith.constant 0 : index
    %c0_187 = arith.constant 0 : index
    %490 = vector.load %arg3[%c0_185, %c0_186, %c0_187] : memref<1x8x128xf32, #tpu.memory_space<vmem>>, vector<1x8x128xf32>
    tpu.vector_store %arg3[%c0_185, %c0_186, %c0_187], %489 {strides = array<i32>} : memref<1x8x128xf32, #tpu.memory_space<vmem>>, vector<1x8x128xf32>,
    return
  }
  func.func @transform_0(%arg0: i32) -> (i32, i32) {
    %c0_i32 = arith.constant 0 : i32
    %c0_i32_0 = arith.constant 0 : i32
    return %arg0, %c0_i32 : i32, i32
  }
  func.func @transform_1(%arg0: i32) -> (i32, i32) {
    %c0_i32 = arith.constant 0 : i32
    %c0_i32_0 = arith.constant 0 : i32
    return %arg0, %c0_i32 : i32, i32
  }
  func.func @transform_2(%arg0: i32) -> (i32, i32, i32) {
    %c0_i32 = arith.constant 0 : i32
    %c0_i32_0 = arith.constant 0 : i32
    %c0_i32_1 = arith.constant 0 : i32
    return %arg0, %c0_i32, %c0_i32_0 : i32, i32, i32
  }
}

</mosaic_0001>

<bundles_post_ra>
// kernel: tpu_custom_call.1
= control target key start
LH: loop header
LB: loop body
LE: loop exit
PB: predicated region body
PF: predicated region fallthrough
CT: control target
= control target key end

     0   :  { %s802_s0 = inlined_call_operand.vmem [shape: f32[8,128], index: 0, kind: input, shape index: {}]   ;;  %s803_s1 = inlined_call_operand.vmem [shape: s32[8,1], index: 1, kind: input, shape index: {}]   ;;  %s804_s2 = inlined_call_operand.hbm [shape: f32[1,8,128], index: 2, kind: output, shape index: {}]  }
   0x1   :  { %v488_v0 = vld [vmem:[%s803_s1] sm:$0xff] }
   0x2   :  { %7 = vsyncpa [#allocation3], 0  ;;  %v453_v1 = vmov 0   ;;  %v12_v2 = vld [vmem:[%s802_s0] sm:$0xff]  ;;  %v15_v10 = vlaneseq  ;;  %s454_s0 = smov 1   ;;  %s455_s1 = smov 127  }
   0x3   :  { %420 = vset.pattern.permute.xlu0 %v453_v1  ;;  %v395_v3 = vmul.f32 -1.442695, %v12_v2  ;;  %vm456_vm4 = vmmov 1   ;;  %s457_s13 = smov 2   ;;  %s458_s14 = smov 126   ;;  %v468_v27 = vmov 0.0  }
   0x4   :  { %23 = vperm.xlu0 %420, %v488_v0   ;;  %v498_v12 = vand.u32 127, %v15_v10  ;;  %s459_s15 = smov 4   ;;  %s460_s16 = smov 124  }
   0x5   :  { %421 = vpow2.f32 %v395_v3  ;;  %s461_s17 = smov 8   ;;  %s462_s18 = smov 120  }
   0x6   :  { %v79_v16 = vand.u32 1, %v498_v12  ;;  %v86_v17 = vand.u32 2, %v498_v12  ;;  %v98_v26 = vand.u32 4, %v498_v12  ;;  %v120_v40 = vand.u32 8, %v498_v12  ;;  %s463_s19 = smov 16   ;;  %s464_s20 = smov 112  }
   0x7   :  { %v152_v60 = vand.u32 16, %v498_v12  ;;  %s465_s21 = smov 32   ;;  %s466_s22 = smov 96  }
   0x8   :  { %vm511_vm1 = vcmp.eq.s32.totalorder %v79_v16, 0  ;;  %vm515_vm2 = vcmp.eq.s32.totalorder %v86_v17, 0  ;;  %vm529_vm6 = vcmp.eq.s32.totalorder %v98_v26, 0  ;;  %vm552_vm11 = vcmp.eq.s32.totalorder %v120_v40, 0  ;;  %s467_s23 = smov 64   ;;  %s469_s27 = smov [#allocation2]  }
   0x9   :  { %vm88_vm3 = vmxor %vm515_vm2, %vm511_vm1  ;;  %s387_s28 = sshll.u32 %s469_s27, 4  ;;  %s388_s28 = int_to_ptr.vmem [resolvable:$true] %s387_s28 }
   0xa   :  { %vm89_vm5 = vmxor %vm88_vm3, %vm456_vm4  ;;  %s429_s29 = scalar_lea.vmem %s388_s28, 128  ;;  %p434_p1 = scmp.lt.s32.totalorder %s388_s28, %s388_s28 }
   0xb   :  { %vm100_vm7 = vmxor %vm529_vm6, %vm515_vm2  ;;  %p430_p0 = scmp.ne.s32.totalorder %s388_s28, %s429_s29  ;;  %p435_p2 = scmp.lt.s32.totalorder %s429_s29, %s429_s29 }
   0xc   :  { %vm101_vm8 = vmxor %vm100_vm7, %vm456_vm4  ;;  %vm584_vm7 = vcmp.eq.s32.totalorder %v152_v60, 0 }
   0xd   :  { %vm110_vm9 = vmxor %vm529_vm6, %vm511_vm1  ;;  %p436_p3 = por %p435_p2, %p434_p1 }
   0xe   :  { %vm111_vm10 = vmxor %vm110_vm9, %vm456_vm4 }
   0xf   :  { %v422_v4 = vpop.eup %421  ;;  %vm122_vm12 = vmxor %vm552_vm11, %vm529_vm6  ;;  %p437_p4 = pnand %p436_p3, %p430_p0 }
  0x10   :  { %v32_v5 = vadd.f32 1.0, %v422_v4  ;;  %vm123_vm13 = vmxor %vm122_vm12, %vm456_vm4 }
  0x11   :  { %vm132_vm14 = vmxor %vm552_vm11, %vm515_vm2 }
  0x12   :  { %423 = vrcp.f32 %v32_v5  ;;  %vm133_vm15 = vmxor %vm132_vm14, %vm456_vm4 }
  0x13   :  { %vm142_vm3 = vmxor %vm552_vm11, %vm511_vm1 }
  0x1c   :  { %v494_v6 = vpop.eup %423 }
  0x1d   :  { %v69_v7 = vsub.f32 1.0, %v494_v6 }
  0x1f   :  { %v70_v8 = vadd.f32 1e-07, %v69_v7 }
  0x21   :  { %425 = vlog2.f32 %v70_v8 }
  0x2b   :  { %v426_v9 = vpop.eup %425 }
  0x2c   :  { %v72_v11 = vmul.f32 0.6931472, %v426_v9 }
  0x2e   :  { %v77_v13 = vsub.f32 0.0, %v72_v11 }
  0x83   :  { %v500_v14 = vpop.permute.xlu0 %23 }
  0x84   :  { %vm25_vm0 = vcmp.eq.s32.totalorder %v498_v12, %v500_v14 }
  0x85   :  { %v78_v15 = vsel %vm25_vm0, 0.0, %v77_v13  ;;  %v39_v41 = vsel %vm25_vm0, %v494_v6, 0.0  ;;  %vm356_vm0 = vcmp.ge.s32.totalorder %v498_v12, 116 }
  0x86   :  { %83 = vrot.lane.b32.xlu1 %v78_v15, %s454_s0  ;;  %81 = vrot.lane.b32.xlu0 %v78_v15, %s455_s1 }
  0xf8   :  { %v84_v20 = vpop.permute.xlu1 %83  ;;  %v82_v21 = vpop.permute.xlu0 %81 }
  0xf9   :  { %v85_v22 = vsel %vm511_vm1, %v82_v21, %v84_v20 }
  0xfa   :  { %v90_v23 = vmin.f32 %v78_v15, %v85_v22  ;;  %v91_v24 = vmax.f32 %v78_v15, %v85_v22 }
  0xfc   :  { %v92_v25 = vsel %vm89_vm5, %v90_v23, %v91_v24  ;;  %vm143_vm5 = vmxor %vm142_vm3, %vm456_vm4 }
  0xfd   :  { %95 = vrot.lane.b32.xlu0 %v92_v25, %s457_s13  ;;  %93 = vrot.lane.b32.xlu1 %v92_v25, %s458_s14 }
 0x16f   :  { %v96_v28 = vpop.permute.xlu0 %95  ;;  %v94_v29 = vpop.permute.xlu1 %93 }
 0x170   :  { %v97_v30 = vsel %vm515_vm2, %v94_v29, %v96_v28 }
 0x171   :  { %v102_v31 = vmin.f32 %v92_v25, %v97_v30  ;;  %v103_v32 = vmax.f32 %v92_v25, %v97_v30  ;;  %v194_v30 = vand.u32 32, %v498_v12 }
 0x173   :  { %v104_v33 = vsel %vm101_vm8, %v102_v31, %v103_v32  ;;  %vm154_vm8 = vmxor %vm584_vm7, %vm552_vm11 }
 0x174   :  { %107 = vrot.lane.b32.xlu0 %v104_v33, %s454_s0  ;;  %105 = vrot.lane.b32.xlu1 %v104_v33, %s455_s1  ;;  %vm155_vm9 = vmxor %vm154_vm8, %vm456_vm4 }
 0x1e6   :  { %v108_v34 = vpop.permute.xlu0 %107  ;;  %v106_v35 = vpop.permute.xlu1 %105 }
 0x1e7   :  { %v109_v36 = vsel %vm511_vm1, %v106_v35, %v108_v34 }
 0x1e8   :  { %v112_v37 = vmin.f32 %v104_v33, %v109_v36  ;;  %v113_v38 = vmax.f32 %v104_v33, %v109_v36 }
 0x1ea   :  { %v114_v39 = vsel %vm111_vm10, %v112_v37, %v113_v38  ;;  %vm164_vm10 = vmxor %vm584_vm7, %vm529_vm6 }
 0x1eb   :  { %117 = vrot.lane.b32.xlu0 %v114_v39, %s459_s15  ;;  %115 = vrot.lane.b32.xlu1 %v114_v39, %s460_s16  ;;  %vm165_vm12 = vmxor %vm164_vm10, %vm456_vm4 }
 0x25d   :  { %v118_v42 = vpop.permute.xlu0 %117  ;;  %v116_v43 = vpop.permute.xlu1 %115 }
 0x25e   :  { %v119_v44 = vsel %vm529_vm6, %v116_v43, %v118_v42 }
 0x25f   :  { %v124_v45 = vmin.f32 %v114_v39, %v119_v44  ;;  %v125_v46 = vmax.f32 %v114_v39, %v119_v44 }
 0x261   :  { %v126_v47 = vsel %vm123_vm13, %v124_v45, %v125_v46  ;;  %vm174_vm13 = vmxor %vm584_vm7, %vm515_vm2 }
 0x262   :  { %129 = vrot.lane.b32.xlu0 %v126_v47, %s457_s13  ;;  %127 = vrot.lane.b32.xlu1 %v126_v47, %s458_s14  ;;  %vm175_vm14 = vmxor %vm174_vm13, %vm456_vm4 }
 0x2d4   :  { %v130_v48 = vpop.permute.xlu0 %129  ;;  %v128_v49 = vpop.permute.xlu1 %127 }
 0x2d5   :  { %v131_v50 = vsel %vm515_vm2, %v128_v49, %v130_v48 }
 0x2d6   :  { %v134_v51 = vmin.f32 %v126_v47, %v131_v50  ;;  %v135_v52 = vmax.f32 %v126_v47, %v131_v50 }
 0x2d8   :  { %v136_v53 = vsel %vm133_vm15, %v134_v51, %v135_v52  ;;  %vm184_vm15 = vmxor %vm584_vm7, %vm511_vm1 }
 0x2d9   :  { %139 = vrot.lane.b32.xlu0 %v136_v53, %s454_s0  ;;  %137 = vrot.lane.b32.xlu1 %v136_v53, %s455_s1  ;;  %vm185_vm3 = vmxor %vm184_vm15, %vm456_vm4 }
 0x34b   :  { %v140_v54 = vpop.permute.xlu0 %139  ;;  %v138_v55 = vpop.permute.xlu1 %137 }
 0x34c   :  { %v141_v56 = vsel %vm511_vm1, %v138_v55, %v140_v54 }
 0x34d   :  { %v144_v57 = vmin.f32 %v136_v53, %v141_v56  ;;  %v145_v58 = vmax.f32 %v136_v53, %v141_v56 }
 0x34f   :  { %v146_v59 = vsel %vm143_vm5, %v144_v57, %v145_v58  ;;  %vm625_vm5 = vcmp.eq.s32.totalorder %v194_v30, 0 }
 0x350   :  { %149 = vrot.lane.b32.xlu0 %v146_v59, %s461_s17  ;;  %147 = vrot.lane.b32.xlu1 %v146_v59, %s462_s18  ;;  %vm196_vm8 = vmxor %vm625_vm5, %vm584_vm7 }
 0x351   :  { %vm206_vm10 = vmxor %vm625_vm5, %vm552_vm11 }
 0x352   :  { %vm216_vm13 = vmxor %vm625_vm5, %vm529_vm6 }
 0x353   :  { %vm226_vm15 = vmxor %vm625_vm5, %vm515_vm2 }
 0x3c2   :  { %v150_v62 = vpop.permute.xlu0 %149  ;;  %v148_v63 = vpop.permute.xlu1 %147 }
 0x3c3   :  { %v151_v1 = vsel %vm552_vm11, %v148_v63, %v150_v62 }
 0x3c4   :  { %v156_v2 = vmin.f32 %v146_v59, %v151_v1  ;;  %v157_v3 = vmax.f32 %v146_v59, %v151_v1  ;;  %v246_v1 = vand.u32 64, %v498_v12 }
 0x3c6   :  { %v158_v4 = vsel %vm155_vm9, %v156_v2, %v157_v3  ;;  %vm197_vm9 = vmxor %vm196_vm8, %vm456_vm4 }
 0x3c7   :  { %161 = vrot.lane.b32.xlu0 %v158_v4, %s459_s15  ;;  %159 = vrot.lane.b32.xlu1 %v158_v4, %s460_s16  ;;  %vm236_vm8 = vmxor %vm625_vm5, %vm511_vm1 }
 0x439   :  { %v162_v5 = vpop.permute.xlu0 %161  ;;  %v160_v7 = vpop.permute.xlu1 %159 }
 0x43a   :  { %v163_v8 = vsel %vm529_vm6, %v160_v7, %v162_v5 }
 0x43b   :  { %v166_v9 = vmin.f32 %v158_v4, %v163_v8  ;;  %v167_v11 = vmax.f32 %v158_v4, %v163_v8 }
 0x43d   :  { %v168_v13 = vsel %vm165_vm12, %v166_v9, %v167_v11  ;;  %vm207_vm12 = vmxor %vm206_vm10, %vm456_vm4  ;;  %vm675_vm10 = vcmp.eq.s32.totalorder %v246_v1, 0 }
 0x43e   :  { %171 = vrot.lane.b32.xlu0 %v168_v13, %s457_s13  ;;  %169 = vrot.lane.b32.xlu1 %v168_v13, %s458_s14 }
 0x4b0   :  { %v172_v15 = vpop.permute.xlu0 %171  ;;  %v170_v16 = vpop.permute.xlu1 %169 }
 0x4b1   :  { %v173_v17 = vsel %vm515_vm2, %v170_v16, %v172_v15 }
 0x4b2   :  { %v176_v20 = vmin.f32 %v168_v13, %v173_v17  ;;  %v177_v21 = vmax.f32 %v168_v13, %v173_v17 }
 0x4b4   :  { %v178_v22 = vsel %vm175_vm14, %v176_v20, %v177_v21  ;;  %vm217_vm14 = vmxor %vm216_vm13, %vm456_vm4 }
 0x4b5   :  { %181 = vrot.lane.b32.xlu0 %v178_v22, %s454_s0  ;;  %179 = vrot.lane.b32.xlu1 %v178_v22, %s455_s1 }
 0x527   :  { %v182_v23 = vpop.permute.xlu0 %181  ;;  %v180_v24 = vpop.permute.xlu1 %179 }
 0x528   :  { %v183_v25 = vsel %vm511_vm1, %v180_v24, %v182_v23 }
 0x529   :  { %v186_v26 = vmin.f32 %v178_v22, %v183_v25  ;;  %v187_v28 = vmax.f32 %v178_v22, %v183_v25 }
 0x52b   :  { %v188_v29 = vsel %vm185_vm3, %v186_v26, %v187_v28  ;;  %vm227_vm3 = vmxor %vm226_vm15, %vm456_vm4 }
 0x52c   :  { %191 = vrot.lane.b32.xlu0 %v188_v29, %s463_s19  ;;  %189 = vrot.lane.b32.xlu1 %v188_v29, %s464_s20 }
 0x59e   :  { %v192_v32 = vpop.permute.xlu0 %191  ;;  %v190_v33 = vpop.permute.xlu1 %189 }
 0x59f   :  { %v193_v34 = vsel %vm584_vm7, %v190_v33, %v192_v32 }
 0x5a0   :  { %v198_v35 = vmin.f32 %v188_v29, %v193_v34  ;;  %v199_v36 = vmax.f32 %v188_v29, %v193_v34 }
 0x5a2   :  { %v200_v37 = vsel %vm197_vm9, %v198_v35, %v199_v36  ;;  %vm237_vm9 = vmxor %vm236_vm8, %vm456_vm4 }
 0x5a3   :  { %203 = vrot.lane.b32.xlu0 %v200_v37, %s461_s17  ;;  %201 = vrot.lane.b32.xlu1 %v200_v37, %s462_s18 }
 0x615   :  { %v204_v38 = vpop.permute.xlu0 %203  ;;  %v202_v39 = vpop.permute.xlu1 %201 }
 0x616   :  { %v205_v40 = vsel %vm552_vm11, %v202_v39, %v204_v38 }
 0x617   :  { %v208_v42 = vmin.f32 %v200_v37, %v205_v40  ;;  %v209_v43 = vmax.f32 %v200_v37, %v205_v40 }
 0x619   :  { %v210_v44 = vsel %vm207_vm12, %v208_v42, %v209_v43  ;;  %vm248_vm12 = vmxor %vm675_vm10, %vm625_vm5 }
 0x61a   :  { %213 = vrot.lane.b32.xlu0 %v210_v44, %s459_s15  ;;  %211 = vrot.lane.b32.xlu1 %v210_v44, %s460_s16  ;;  %vm249_vm13 = vmxor %vm248_vm12, %vm456_vm4 }
 0x68c   :  { %v214_v45 = vpop.permute.xlu0 %213  ;;  %v212_v46 = vpop.permute.xlu1 %211 }
 0x68d   :  { %v215_v47 = vsel %vm529_vm6, %v212_v46, %v214_v45 }
 0x68e   :  { %v218_v48 = vmin.f32 %v210_v44, %v215_v47  ;;  %v219_v49 = vmax.f32 %v210_v44, %v215_v47 }
 0x690   :  { %v220_v50 = vsel %vm217_vm14, %v218_v48, %v219_v49  ;;  %vm258_vm14 = vmxor %vm675_vm10, %vm584_vm7 }
 0x691   :  { %223 = vrot.lane.b32.xlu0 %v220_v50, %s457_s13  ;;  %221 = vrot.lane.b32.xlu1 %v220_v50, %s458_s14  ;;  %vm259_vm15 = vmxor %vm258_vm14, %vm456_vm4 }
 0x703   :  { %v224_v51 = vpop.permute.xlu0 %223  ;;  %v222_v52 = vpop.permute.xlu1 %221 }
 0x704   :  { %v225_v53 = vsel %vm515_vm2, %v222_v52, %v224_v51 }
 0x705   :  { %v228_v54 = vmin.f32 %v220_v50, %v225_v53  ;;  %v229_v55 = vmax.f32 %v220_v50, %v225_v53 }
 0x707   :  { %v230_v56 = vsel %vm227_vm3, %v228_v54, %v229_v55  ;;  %vm268_vm3 = vmxor %vm675_vm10, %vm552_vm11 }
 0x708   :  { %233 = vrot.lane.b32.xlu0 %v230_v56, %s454_s0  ;;  %231 = vrot.lane.b32.xlu1 %v230_v56, %s455_s1  ;;  %vm269_vm8 = vmxor %vm268_vm3, %vm456_vm4 }
 0x77a   :  { %v234_v57 = vpop.permute.xlu0 %233  ;;  %v232_v58 = vpop.permute.xlu1 %231 }
 0x77b   :  { %v235_v59 = vsel %vm511_vm1, %v232_v58, %v234_v57 }
 0x77c   :  { %v238_v60 = vmin.f32 %v230_v56, %v235_v59  ;;  %v239_v62 = vmax.f32 %v230_v56, %v235_v59 }
 0x77e   :  { %v240_v63 = vsel %vm237_vm9, %v238_v60, %v239_v62  ;;  %vm278_vm9 = vmxor %vm675_vm10, %vm529_vm6 }
 0x77f   :  { %243 = vrot.lane.b32.xlu0 %v240_v63, %s465_s21  ;;  %241 = vrot.lane.b32.xlu1 %v240_v63, %s466_s22  ;;  %vm279_vm12 = vmxor %vm278_vm9, %vm456_vm4 }
 0x7f1   :  { %v244_v3 = vpop.permute.xlu0 %243  ;;  %v242_v4 = vpop.permute.xlu1 %241 }
 0x7f2   :  { %v245_v5 = vsel %vm625_vm5, %v242_v4, %v244_v3 }
 0x7f3   :  { %v250_v7 = vmin.f32 %v240_v63, %v245_v5  ;;  %v251_v8 = vmax.f32 %v240_v63, %v245_v5 }
 0x7f5   :  { %v252_v9 = vsel %vm249_vm13, %v250_v7, %v251_v8  ;;  %vm288_vm13 = vmxor %vm675_vm10, %vm515_vm2 }
 0x7f6   :  { %255 = vrot.lane.b32.xlu0 %v252_v9, %s463_s19  ;;  %253 = vrot.lane.b32.xlu1 %v252_v9, %s464_s20  ;;  %vm289_vm14 = vmxor %vm288_vm13, %vm456_vm4 }
 0x868   :  { %v256_v11 = vpop.permute.xlu0 %255  ;;  %v254_v13 = vpop.permute.xlu1 %253 }
 0x869   :  { %v257_v15 = vsel %vm584_vm7, %v254_v13, %v256_v11 }
 0x86a   :  { %v260_v16 = vmin.f32 %v252_v9, %v257_v15  ;;  %v261_v17 = vmax.f32 %v252_v9, %v257_v15 }
 0x86c   :  { %v262_v20 = vsel %vm259_vm15, %v260_v16, %v261_v17  ;;  %vm298_vm15 = vmxor %vm675_vm10, %vm511_vm1 }
 0x86d   :  { %265 = vrot.lane.b32.xlu0 %v262_v20, %s461_s17  ;;  %263 = vrot.lane.b32.xlu1 %v262_v20, %s462_s18  ;;  %vm299_vm3 = vmxor %vm298_vm15, %vm456_vm4  ;;  %vm35_vm4 = vcmp.ge.s32.totalorder %v488_v0, 0 }
 0x8df   :  { %v266_v21 = vpop.permute.xlu0 %265  ;;  %v264_v22 = vpop.permute.xlu1 %263 }
 0x8e0   :  { %v267_v23 = vsel %vm552_vm11, %v264_v22, %v266_v21 }
 0x8e1   :  { %v270_v24 = vmin.f32 %v262_v20, %v267_v23  ;;  %v271_v25 = vmax.f32 %v262_v20, %v267_v23 }
 0x8e3   :  { %v272_v26 = vsel %vm269_vm8, %v270_v24, %v271_v25 }
 0x8e4   :  { %275 = vrot.lane.b32.xlu0 %v272_v26, %s459_s15  ;;  %273 = vrot.lane.b32.xlu1 %v272_v26, %s460_s16 }
 0x956   :  { %v276_v28 = vpop.permute.xlu0 %275  ;;  %v274_v29 = vpop.permute.xlu1 %273 }
 0x957   :  { %v277_v30 = vsel %vm529_vm6, %v274_v29, %v276_v28 }
 0x958   :  { %v280_v32 = vmin.f32 %v272_v26, %v277_v30  ;;  %v281_v33 = vmax.f32 %v272_v26, %v277_v30 }
 0x95a   :  { %v282_v34 = vsel %vm279_vm12, %v280_v32, %v281_v33 }
 0x95b   :  { %285 = vrot.lane.b32.xlu0 %v282_v34, %s457_s13  ;;  %283 = vrot.lane.b32.xlu1 %v282_v34, %s458_s14 }
 0x9cd   :  { %v286_v35 = vpop.permute.xlu0 %285  ;;  %v284_v36 = vpop.permute.xlu1 %283 }
 0x9ce   :  { %v287_v37 = vsel %vm515_vm2, %v284_v36, %v286_v35 }
 0x9cf   :  { %v290_v38 = vmin.f32 %v282_v34, %v287_v37  ;;  %v291_v39 = vmax.f32 %v282_v34, %v287_v37 }
 0x9d1   :  { %v292_v40 = vsel %vm289_vm14, %v290_v38, %v291_v39 }
 0x9d2   :  { %295 = vrot.lane.b32.xlu0 %v292_v40, %s454_s0  ;;  %293 = vrot.lane.b32.xlu1 %v292_v40, %s455_s1 }
 0xa44   :  { %v296_v42 = vpop.permute.xlu0 %295  ;;  %v294_v43 = vpop.permute.xlu1 %293 }
 0xa45   :  { %v297_v44 = vsel %vm511_vm1, %v294_v43, %v296_v42 }
 0xa46   :  { %v300_v45 = vmin.f32 %v292_v40, %v297_v44  ;;  %v301_v46 = vmax.f32 %v292_v40, %v297_v44 }
 0xa48   :  { %v302_v47 = vsel %vm299_vm3, %v300_v45, %v301_v46 }
 0xa49   :  { %303 = vrot.lane.b32.xlu1 %v302_v47, %s467_s23 }
 0xabb   :  { %v304_v48 = vpop.permute.xlu1 %303 }
 0xabc   :  { %v305_v49 = vmin.f32 %v302_v47, %v304_v48  ;;  %v306_v50 = vmax.f32 %v302_v47, %v304_v48 }
 0xabe   :  { %v307_v51 = vsel %vm675_vm10, %v305_v49, %v306_v50  ;;  %vm368_vm10 = vcmp.eq.s32.totalorder %v498_v12, 0 }
 0xabf   :  { %310 = vrot.lane.b32.xlu1 %v307_v51, %s465_s21  ;;  %308 = vrot.lane.b32.xlu0 %v307_v51, %s466_s22 }
 0xb31   :  { %v311_v52 = vpop.permute.xlu1 %310  ;;  %v309_v53 = vpop.permute.xlu0 %308 }
 0xb32   :  { %v312_v54 = vsel %vm625_vm5, %v309_v53, %v311_v52 }
 0xb33   :  { %v313_v55 = vmin.f32 %v307_v51, %v312_v54  ;;  %v314_v56 = vmax.f32 %v307_v51, %v312_v54 }
 0xb35   :  { %v315_v57 = vsel %vm625_vm5, %v313_v55, %v314_v56  ;;  %vm46_vm5 = vcmask 7168  }
 0xb36   :  { %318 = vrot.lane.b32.xlu1 %v315_v57, %s463_s19  ;;  %316 = vrot.lane.b32.xlu0 %v315_v57, %s464_s20 }
 0xba8   :  { %v319_v58 = vpop.permute.xlu1 %318  ;;  %v317_v59 = vpop.permute.xlu0 %316 }
 0xba9   :  { %v320_v60 = vsel %vm584_vm7, %v317_v59, %v319_v58  ;;  %v16_v59 = vshrl.u32 %v15_v10, 7 }
 0xbaa   :  { %v321_v62 = vmin.f32 %v315_v57, %v320_v60  ;;  %v322_v63 = vmax.f32 %v315_v57, %v320_v60 }
 0xbac   :  { %v323_v1 = vsel %vm584_vm7, %v321_v62, %v322_v63 }
 0xbad   :  { %326 = vrot.lane.b32.xlu1 %v323_v1, %s461_s17  ;;  %324 = vrot.lane.b32.xlu0 %v323_v1, %s462_s18 }
 0xc1f   :  { %v327_v31 = vpop.permute.xlu1 %326  ;;  %v325_v2 = vpop.permute.xlu0 %324 }
 0xc20   :  { %v328_v3 = vsel %vm552_vm11, %v325_v2, %v327_v31 }
 0xc21   :  { %v329_v4 = vmin.f32 %v323_v1, %v328_v3  ;;  %v330_v5 = vmax.f32 %v323_v1, %v328_v3 }
 0xc23   :  { %v331_v7 = vsel %vm552_vm11, %v329_v4, %v330_v5  ;;  %vm37_vm11 = vcmp.lt.s32.totalorder %v488_v0, 128 }
 0xc24   :  { %334 = vrot.lane.b32.xlu1 %v331_v7, %s459_s15  ;;  %332 = vrot.lane.b32.xlu0 %v331_v7, %s460_s16  ;;  %vm765_vm7 = vmand %vm35_vm4, %vm37_vm11 }
 0xc25   :  { %v396_v17 = vsel %vm765_vm7, 1.0, %v468_v27 }
 0xc26   :  { %v59_v20 = vsel %vm46_vm5, %v396_v17, 0.0 }
 0xc96   :  { %v335_v61 = vpop.permute.xlu1 %334  ;;  %v333_v8 = vpop.permute.xlu0 %332 }
 0xc97   :  { %v336_v9 = vsel %vm529_vm6, %v333_v8, %v335_v61 }
 0xc98   :  { %v337_v11 = vmin.f32 %v331_v7, %v336_v9  ;;  %v338_v13 = vmax.f32 %v331_v7, %v336_v9 }
 0xc9a   :  { %v339_v15 = vsel %vm529_vm6, %v337_v11, %v338_v13  ;;  %vm370_vm6 = vcmp.eq.s32.totalorder %v498_v12, 1 }
 0xc9b   :  { %342 = vrot.lane.b32.xlu1 %v339_v15, %s457_s13  ;;  %340 = vrot.lane.b32.xlu0 %v339_v15, %s458_s14 }
 0xcba   :  { %40 = vadd.xlane.f32.xlu0 %v39_v41 }
 0xcbe   :  { %60 = vadd.xlane.f32.xlu0 %v59_v20 }
 0xd0d   :  { %v343_v21 = vpop.permute.xlu1 %342  ;;  %v341_v14 = vpop.permute.xlu0 %340 }
 0xd0e   :  { %v344_v6 = vsel %vm515_vm2, %v341_v14, %v343_v21 }
 0xd0f   :  { %v345_v22 = vmin.f32 %v339_v15, %v344_v6  ;;  %v346_v23 = vmax.f32 %v339_v15, %v344_v6 }
 0xd11   :  { %v347_v0 = vsel %vm515_vm2, %v345_v22, %v346_v23  ;;  %vm372_vm2 = vcmp.eq.s32.totalorder %v498_v12, 2 }
 0xd12   :  { %348 = vrot.lane.b32.xlu1 %v347_v0, %s455_s1 }
 0xd16   :  { %350 = vrot.lane.b32.xlu1 %v347_v0, %s454_s0 }
 0xd47   :  { %v41_v24 = vpop.xlane.xlu0 %40 }
 0xd48   :  { %v42_v25 = vadd.f32 1e-07, %v41_v24 }
 0xd4a   :  { %427 = vlog2.f32 %v42_v25 }
 0xd4b   :  { %v61_v38 = vpop.xlane.xlu0 %60 }
 0xd4c   :  { %v62_v39 = vrot.slane %v61_v38, 4 }
 0xd4e   :  { %v63_v40 = vadd.f32 %v62_v39, %v61_v38 }
 0xd50   :  { %v64_v42 = vrot.slane %v63_v40, 2 }
 0xd52   :  { %v65_v45 = vadd.f32 %v64_v42, %v63_v40 }
 0xd54   :  { %v428_v26 = vpop.eup %427  ;;  %v66_v48 = vrot.slane %v65_v45, 1 }
 0xd55   :  { %v44_v28 = vmul.f32 0.6931472, %v428_v26 }
 0xd56   :  { %v67_v51 = vadd.f32 %v66_v48, %v65_v45 }
 0xd57   :  { %v45_v29 = vsel %vm765_vm7, %v44_v28, 0.0 }
 0xd58   :  { %v47_v30 = vsel %vm46_vm5, %v45_v29, 0.0 }
 0xd59   :  { %48 = vadd.xlane.f32.xlu1 %v47_v30 }
 0xd84   :  { %v349_v32 = vpop.permute.xlu1 %348 }
 0xd88   :  { %v351_v33 = vpop.permute.xlu1 %350 }
 0xd89   :  { %v352_v19 = vsel %vm511_vm1, %v349_v32, %v351_v33 }
 0xd8a   :  { %v353_v34 = vmin.f32 %v347_v0, %v352_v19  ;;  %v354_v35 = vmax.f32 %v347_v0, %v352_v19 }
 0xd8c   :  { %v355_v36 = vsel %vm511_vm1, %v353_v34, %v354_v35  ;;  %vm367_vm1 = vcmp.eq.s32.totalorder %v16_v59, 0 }
 0xd8d   :  { %v357_v37 = vsel %vm356_vm0, %v355_v36, 0.0  ;;  %vm373_vm8 = vmand %vm367_vm1, %vm372_vm2 }
 0xd8e   :  { %358 = vadd.xlane.f32.xlu0 %v357_v37  ;;  %vm371_vm9 = vmand %vm367_vm1, %vm370_vm6 }
 0xd8f   :  { %vm369_vm12 = vmand %vm367_vm1, %vm368_vm10 }
 0xde6   :  { %v49_v43 = vpop.xlane.xlu1 %48 }
 0xde7   :  { %v50_v44 = vrot.slane %v49_v43, 4 }
 0xde9   :  { %v51_v46 = vadd.f32 %v50_v44, %v49_v43 }
 0xdeb   :  { %v52_v47 = vrot.slane %v51_v46, 2 }
 0xded   :  { %v53_v49 = vadd.f32 %v52_v47, %v51_v46 }
 0xdef   :  { %v54_v50 = vrot.slane %v53_v49, 1 }
 0xdf1   :  { %v55_v52 = vadd.f32 %v54_v50, %v53_v49 }
 0xdf3   :  { %397 = vpush %v55_v52 }
 0xdf4   :  { %399 = vpush %v67_v51 }
 0xe1b   :  { %v359_v18 = vpop.xlane.xlu0 %358 }
 0xe1c   :  { %v360_v53 = vrot.slane %v359_v18, 4 }
 0xe1e   :  { %v361_v54 = vadd.f32 %v360_v53, %v359_v18 }
 0xe20   :  { %v362_v55 = vrot.slane %v361_v54, 2 }
 0xe22   :  { %v363_v56 = vadd.f32 %v362_v55, %v361_v54 }
 0xe24   :  { %v364_v57 = vrot.slane %v363_v56, 1  ;;  %s398_s24 = spop %397 }
 0xe25   :  { %s400_s25 = spop %399  ;;  %v378_v1 = vstv %s398_s24 }
 0xe26   :  { %v365_v58 = vadd.f32 %v364_v57, %v363_v56  ;;  %v376_v62 = vstv %s400_s25 }
 0xe28   :  { %401 = vpush %v365_v58 }
 0xe59   :  { %s402_s26 = spop %401 }
 0xe5a   :  { %v374_v60 = vstv %s402_s26 }
 0xe5b   :  { %v375_v63 = vsel %vm373_vm8, %v374_v60, 0.0 }
 0xe5c   :  { %v377_v10 = vsel %vm371_vm9, %v376_v62, %v375_v63 }
 0xe5d   :  { %v379_v31 = vsel %vm369_vm12, %v378_v1, %v377_v10 }
 0xe5e   :  { %380 = vst [vmem:[#allocation2] sm:$0xff] %v379_v31 }
 0xe5f   :  { %440 = shalt.err (!%p437_p4)
}
 0xe60   :  { %s441_s4 = scalar_lea.hbm %s804_s2, 128 }
 0xe61   :  { %p442_p5 = scmp.ne.s32.totalorder %s804_s2, %s441_s4  ;;  %p445_p6 = scmp.lt.u32.totalorder %s441_s4, %s804_s2 }
 0xe63   :  { %p447_p7 = pnand %p445_p6, %p442_p5 }
 0xe65   :  { %450 = shalt.err (!%p447_p7)
}
 0xe66   :  { %390 = dma.vmem_to_hbm [thread:$0]  %s388_s28, 128, %s804_s2, [#allocation3]  }
 0xe67   :  { %451 = dma.done.wait [#allocation3], 128  }
 0xe68   :  { %452 = vsyncadd [#allocation3], 4294967168 }
 0xe69   :  { %394 = vsyncpa [#allocation3], 1 }

</bundles_post_ra>
